<compile_context>
chip_gen: v7x
topology: tpu7x:2x2x1
jax: 0.10.0
libtpu: 0.0.40
codegen_flags: <defaults>
</compile_context>

<pallas_src>
import functools

import jax
import jax.numpy as jnp
from jax.experimental import pallas as pl
from jax.experimental.pallas import tpu as pltpu


# ----------------------------------------------------------------------------
# helpers
# ----------------------------------------------------------------------------
def _round_up(x, m):
    return (x + m - 1) // m * m


_VMEM_LIMIT = 32 * 1024 * 1024  # explicit scoped-VMEM budget; safe on v5e/v6e/v7x


def _pick_row_tile(m, tile_m):
    """Row tile: multiple of 8 (sublane), capped by tile_m, and split >= 2 ways
    when m permits so the "parallel" row axis can shard across v7x's 2 cores."""
    tm = min(tile_m, _round_up(m, 8))
    if m >= 16 and pl.cdiv(m, tm) < 2:
        tm = _round_up(pl.cdiv(m, 2), 8)
    return tm


# ----------------------------------------------------------------------------
# Pallas kernels
# ----------------------------------------------------------------------------
def _linear_kernel(x_ref, w_ref, b_ref, o_ref):
    # x: (tm, K) float, w: (K, N) bf16, b: (1, N) f32 -> o: (tm, N) o_ref.dtype
    x = x_ref[...].astype(jnp.bfloat16)
    acc = jnp.dot(x, w_ref[...], preferred_element_type=jnp.float32)
    o_ref[...] = (acc + b_ref[...]).astype(o_ref.dtype)


def _mlp_kernel(x_ref, w1_ref, b1_ref, w2_ref, b2_ref, w3_ref, b3_ref, o_ref, h_ref):
    # Fused 3-layer MLP.  h_ref: (tm, h2) bf16 VMEM scratch holding the output of
    # layers 1-2, computed once per row tile (vocab step j == 0) and reused for
    # every vocab tile j.  bf16 MXU matmuls, f32 accumulation / bias / ReLU.
    @pl.when(pl.program_id(1) == 0)
    def _():
        h = jnp.dot(x_ref[...].astype(jnp.bfloat16), w1_ref[...],
                    preferred_element_type=jnp.float32) + b1_ref[...]
        h = jnp.maximum(h, 0.0).astype(jnp.bfloat16)
        h = jnp.dot(h, w2_ref[...], preferred_element_type=jnp.float32) + b2_ref[...]
        h_ref[...] = jnp.maximum(h, 0.0).astype(jnp.bfloat16)

    o_ref[...] = jnp.dot(h_ref[...], w3_ref[...],
                         preferred_element_type=jnp.float32) + b3_ref[...]


# ----------------------------------------------------------------------------
# Pallas wrappers (grid + BlockSpec tiling)
# ----------------------------------------------------------------------------
def linear_pallas(x, w, b, *, tile_m=512, out_dtype=jnp.float32):
    """Row-tiled y = x @ w + b.  x: (M, K) float, w: (K, N) bf16, b: (1, N) f32."""
    m, k = x.shape
    n = w.shape[1]
    tm = _pick_row_tile(m, tile_m)
    grid = (pl.cdiv(m, tm),)  # ragged last row block is masked by Pallas; no pad/slice

    return pl.pallas_call(
        _linear_kernel,
        out_shape=jax.ShapeDtypeStruct((m, n), out_dtype),
        grid_spec=pltpu.PrefetchScalarGridSpec(
            num_scalar_prefetch=0,
            grid=grid,
            in_specs=[
                pl.BlockSpec((tm, k), lambda i: (i, 0)),   # row tile of activations
                pl.BlockSpec((k, n), lambda i: (0, 0)),    # resident weight
                pl.BlockSpec((1, n), lambda i: (0, 0)),    # resident bias
            ],
            out_specs=pl.BlockSpec((tm, n), lambda i: (i, 0)),
        ),
        compiler_params=pltpu.CompilerParams(
            dimension_semantics=("parallel",),
            vmem_limit_bytes=_VMEM_LIMIT,
        ),
        cost_estimate=pl.CostEstimate(
            flops=2 * m * k * n,
            transcendentals=0,
            bytes_accessed=(m * k * x.dtype.itemsize + k * n * 2 + n * 4
                            + m * n * jnp.dtype(out_dtype).itemsize),
        ),
    )(x, w, b)


def mlp_head(x, params, *, tile_m=256, tile_v=1024):
    """Fused MLP(hidden, 512, vocab, 3).  x: (M, hidden) -> (M, vocab) f32 logits."""
    (w1, b1), (w2, b2), (w3, b3) = params
    m, d = x.shape
    h1 = w1.shape[1]
    h2 = w2.shape[1]
    v = w3.shape[1]

    tm = _pick_row_tile(m, tile_m)
    tv = min(tile_v, _round_up(v, 128))          # always a multiple of 128 (lane-dense)
    vp = _round_up(v, tv)
    if vp != v:
        # TODO(synk): for production vocab sizes pad w3/b3 (and logits) at init
        # time so this per-call pad and the [:, :v] slice below disappear.
        w3 = jnp.pad(w3, ((0, 0), (0, vp - v)))
        b3 = jnp.pad(b3, ((0, 0), (0, vp - v)))

    num_i = pl.cdiv(m, tm)
    grid = (num_i, vp // tv)   # row axis outer ("parallel"), vocab axis inner ("arbitrary")

    out = pl.pallas_call(
        _mlp_kernel,
        out_shape=jax.ShapeDtypeStruct((m, vp), jnp.float32),
        grid_spec=pltpu.PrefetchScalarGridSpec(
            num_scalar_prefetch=0,
            grid=grid,
            in_specs=[
                pl.BlockSpec((tm, d), lambda i, j: (i, 0)),    # row tile (DMA'd once per i)
                pl.BlockSpec((d, h1), lambda i, j: (0, 0)),    # resident w1
                pl.BlockSpec((1, h1), lambda i, j: (0, 0)),    # resident b1
                pl.BlockSpec((h1, h2), lambda i, j: (0, 0)),   # resident w2
                pl.BlockSpec((1, h2), lambda i, j: (0, 0)),    # resident b2
                pl.BlockSpec((h2, tv), lambda i, j: (0, j)),   # vocab tile of w3
                pl.BlockSpec((1, tv), lambda i, j: (0, j)),    # vocab tile of b3
            ],
            out_specs=pl.BlockSpec((tm, tv), lambda i, j: (i, j)),
            scratch_shapes=[pltpu.VMEM((tm, h2), jnp.bfloat16)],  # layers 1-2 cache
        ),
        compiler_params=pltpu.CompilerParams(
            dimension_semantics=("parallel", "arbitrary"),
            vmem_limit_bytes=_VMEM_LIMIT,
        ),
        cost_estimate=pl.CostEstimate(
            flops=2 * m * (d * h1 + h1 * h2 + h2 * vp),
            transcendentals=0,
            bytes_accessed=(m * d * x.dtype.itemsize
                            + (d * h1 + h1 * h2) * 2 + (h1 + h2) * 4
                            + num_i * (h2 * vp * 2 + vp * 4)   # w3/b3 re-streamed per row tile
                            + m * vp * 4),
        ),
    )(x, w1, b1, w2, b2, w3, b3)
    return out[:, :v] if vp != v else out


# ----------------------------------------------------------------------------
# Multitask forward (glue in plain JAX, hot paths in Pallas)
# ----------------------------------------------------------------------------
def init_multitask_params(key, num_channels, hidden_dim, vocab_size, num_dates):
    k = jax.random.split(key, 11)
    scale = 0.02
    bf16 = jnp.bfloat16

    def wgt(kk, shape):
        return (scale * jax.random.normal(kk, shape, jnp.float32)).astype(bf16)

    def bias(kk, n):
        return scale * jax.random.normal(kk, (1, n), jnp.float32)

    return {
        # input_proj: Conv2d(num_channels, hidden_dim, kernel_size=1)
        # stored as (Cin, Cout) bf16 ( == PyTorch weight.reshape(Cout, Cin).T )
        "proj_w": wgt(k[0], (num_channels, hidden_dim)),
        "proj_b": bias(k[1], hidden_dim),
        # caption head: MLP(hidden, 512, vocab, 3); weights bf16 (in, out), biases f32 (1, out)
        "mlp": (
            (wgt(k[2], (hidden_dim, 512)), bias(k[3], 512)),
            (wgt(k[4], (512, 512)), bias(k[5], 512)),
            (wgt(k[6], (512, vocab_size)), bias(k[7], vocab_size)),
        ),
        # token-embedding table for the decoder stand-in (bf16, matches `memory`)
        "tok_embed": wgt(k[8], (vocab_size, hidden_dim)),
        # datation head: Linear(hidden, num_dates)
        "date_w": wgt(k[9], (hidden_dim, num_dates)),
        "date_b": bias(k[10], num_dates),
    }


def encoder_standin(params, samples):
    # TODO(synk): `encoder` (backbone + transformer encoder) is an external module
    # passed into Multitask.__init__ with no definition here; this stand-in only
    # reproduces the (memory, mask, pos) shape contract and runs the 1x1 channel
    # projection in Pallas.
    b, c, h, w = samples.shape
    hidden = params["proj_w"].shape[1]
    # single NCHW -> NHWC transpose; everything downstream stays in the
    # (B, H*W, hidden) bf16 layout (no transpose back, no f32 writeback).
    x_flat = jnp.transpose(samples, (0, 2, 3, 1)).reshape(b * h * w, c)
    mem_flat = linear_pallas(x_flat, params["proj_w"], params["proj_b"],
                             out_dtype=jnp.bfloat16)                  # Pallas
    memory = mem_flat.reshape(b, h * w, hidden)
    # mask / pos belong to the external encoder; all-zero placeholders are NOT
    # materialized (adding a zero pos tensor would cost extra HBM passes).
    return memory, None, None


def caption_decoder_standin(params, memory, mask, pos, target, target_mask):
    # TODO(synk): the real captioning decoder (cross-attention transformer) is an
    # external module; this stand-in reproduces only the (B, S, vocab) output
    # contract and runs the vocab MLP head in Pallas.
    b, _, d = memory.shape
    mem_pooled = jnp.mean(memory, axis=1, dtype=jnp.float32)       # (B, hidden) f32 accumulation
    tgt = params["tok_embed"][target]                              # (B, S, hidden) bf16 gather
    tgt = jnp.where(target_mask[..., None], 0.0, tgt)
    hs = tgt + mem_pooled[:, None, :].astype(jnp.bfloat16)         # (B, S, hidden) bf16
    s = hs.shape[1]
    logits = mlp_head(hs.reshape(b * s, d), params["mlp"])         # Pallas fused MLP
    return logits.reshape(b, s, -1)                                # (B, S, vocab) f32


def datation_standin(params, memory):
    # TODO(synk): the real datation head is an external module; stand-in = mean
    # pool over spatial positions + a Pallas linear classifier over dates.
    pooled = jnp.mean(memory, axis=1, dtype=jnp.float32)           # (B, hidden)
    return linear_pallas(pooled, params["date_w"], params["date_b"],
                         out_dtype=jnp.float32)


@functools.partial(jax.jit, static_argnums=(1,))
def multitask_forward(params, task, samples, target=None, target_mask=None):
    memory, mask, pos = encoder_standin(params, samples)
    if task == "captioning":
        return caption_decoder_standin(params, memory, mask, pos, target, target_mask)
    elif task == "datation":
        return datation_standin(params, memory)
    else:
        raise NotImplementedError(f'Task {task} not in ["captioning", "datation"]')


# ----------------------------------------------------------------------------
# main
# ----------------------------------------------------------------------------
if __name__ == "__main__":
    batch = 2
    num_channels = 128     # encoder feature channels (lane-dense contraction dim)
    hidden_dim = 128       # multiple of 128 -> lane-dense memory / MLP input
    vocab_size = 256       # multiple of 128 -> lane-dense vocab logits
    num_dates = 128
    H = W = 16
    seq_len = 8

    key = jax.random.PRNGKey(0)
    k_samples, k_target, k_params = jax.random.split(key, 3)

    samples = jax.random.normal(k_samples, (batch, num_channels, H, W), jnp.float32)
    target = jax.random.randint(k_target, (batch, seq_len), 0, vocab_size, jnp.int32)
    target_mask = jnp.zeros((batch, seq_len), dtype=jnp.bool_)

    params = init_multitask_params(k_params, num_channels, hidden_dim, vocab_size, num_dates)

    cap = jax.block_until_ready(
        multitask_forward(params, "captioning", samples, target, target_mask))
    dat = jax.block_until_ready(multitask_forward(params, "datation", samples))

    assert cap.shape == (batch, seq_len, vocab_size), cap.shape
    assert dat.shape == (batch, num_dates), dat.shape
    assert jnp.all(jnp.isfinite(cap)) and jnp.all(jnp.isfinite(dat))
    print("KERNEL_OK")
</pallas_src>

<mosaic_0001>
module attributes {stable_mosaic.version = 11 : i64} {
  func.func @_linear_kernel(%arg0: i32, %arg1: memref<256x128xf32, #tpu.memory_space<vmem>>, %arg2: memref<128x128xbf16, #tpu.memory_space<vmem>>, %arg3: memref<1x128xf32, #tpu.memory_space<vmem>>, %arg4: memref<256x128xbf16, #tpu.memory_space<vmem>>) attributes {dimension_semantics = [#tpu.dimension_semantics<parallel>], iteration_bounds = array<i64: 2>, scalar_prefetch = 0 : i64, scratch_operands = 0 : i64, tpu.core_type = #tpu.core_type<tc>, window_params = [{transform_indices = @transform_0, window_bounds = array<i64: 256, 128>}, {pipeline_mode = #tpu.pipeline_mode<synchronous>, transform_indices = @transform_1, window_bounds = array<i64: 128, 128>}, {pipeline_mode = #tpu.pipeline_mode<synchronous>, transform_indices = @transform_2, window_bounds = array<i64: 1, 128>}, {transform_indices = @transform_3, window_bounds = array<i64: 256, 128>}]} {
    %c0 = arith.constant 0 : index
    %c0_0 = arith.constant 0 : index
    %0 = vector.load %arg1[%c0, %c0_0] : memref<256x128xf32, #tpu.memory_space<vmem>>, vector<256x128xf32>
    %1 = arith.truncf %0 : vector<256x128xf32> to vector<256x128xbf16>
    %c0_1 = arith.constant 0 : index
    %c0_2 = arith.constant 0 : index
    %2 = vector.load %arg2[%c0_1, %c0_2] : memref<128x128xbf16, #tpu.memory_space<vmem>>, vector<128x128xbf16>
    %cst = arith.constant dense<0.000000e+00> : vector<256x128xf32>
    %3 = tpu.matmul %1, %2, %cst {dimension_numbers = #tpu.dot_dimension_numbers<[1], [0], [0], [1], [0, 0, 1, 1], [], []>} : vector<256x128xbf16>, vector<128x128xbf16>, vector<256x128xf32> -> vector<256x128xf32>
    %c0_3 = arith.constant 0 : index
    %c0_4 = arith.constant 0 : index
    %4 = vector.load %arg3[%c0_3, %c0_4] : memref<1x128xf32, #tpu.memory_space<vmem>>, vector<1x128xf32>
    %5 = vector.broadcast %4 : vector<1x128xf32> to vector<256x128xf32>
    %6 = arith.addf %3, %5 : vector<256x128xf32>
    %7 = arith.truncf %6 : vector<256x128xf32> to vector<256x128xbf16>
    %c0_5 = arith.constant 0 : index
    %c0_6 = arith.constant 0 : index
    %8 = vector.load %arg4[%c0_5, %c0_6] : memref<256x128xbf16, #tpu.memory_space<vmem>>, vector<256x128xbf16>
    tpu.vector_store %arg4[%c0_5, %c0_6], %7 {strides = array<i32>} : memref<256x128xbf16, #tpu.memory_space<vmem>>, vector<256x128xbf16>,
    return
  }
  func.func @transform_0(%arg0: i32) -> (i32, i32) {
    %c0_i32 = arith.constant 0 : i32
    %c0_i32_0 = arith.constant 0 : i32
    return %arg0, %c0_i32 : i32, i32
  }
  func.func @transform_1(%arg0: i32) -> (i32, i32) {
    %c0_i32 = arith.constant 0 : i32
    %c0_i32_0 = arith.constant 0 : i32
    %c0_i32_1 = arith.constant 0 : i32
    return %c0_i32, %c0_i32_0 : i32, i32
  }
  func.func @transform_2(%arg0: i32) -> (i32, i32) {
    %c0_i32 = arith.constant 0 : i32
    %c0_i32_0 = arith.constant 0 : i32
    %c0_i32_1 = arith.constant 0 : i32
    return %c0_i32, %c0_i32_0 : i32, i32
  }
  func.func @transform_3(%arg0: i32) -> (i32, i32) {
    %c0_i32 = arith.constant 0 : i32
    %c0_i32_0 = arith.constant 0 : i32
    return %arg0, %c0_i32 : i32, i32
  }
}

module attributes {stable_mosaic.version = 11 : i64} {
  func.func @_mlp_kernel(%arg0: i32, %arg1: i32, %arg2: memref<8x128xbf16, #tpu.memory_space<vmem>>, %arg3: memref<128x512xbf16, #tpu.memory_space<vmem>>, %arg4: memref<1x512xf32, #tpu.memory_space<vmem>>, %arg5: memref<512x512xbf16, #tpu.memory_space<vmem>>, %arg6: memref<1x512xf32, #tpu.memory_space<vmem>>, %arg7: memref<512x256xbf16, #tpu.memory_space<vmem>>, %arg8: memref<1x256xf32, #tpu.memory_space<vmem>>, %arg9: memref<8x256xf32, #tpu.memory_space<vmem>>, %arg10: memref<8x512xbf16, #tpu.memory_space<vmem>>) attributes {dimension_semantics = [#tpu.dimension_semantics<parallel>, #tpu.dimension_semantics<arbitrary>], iteration_bounds = array<i64: 2, 1>, scalar_prefetch = 0 : i64, scratch_operands = 1 : i64, tpu.core_type = #tpu.core_type<tc>, window_params = [{transform_indices = @transform_0, window_bounds = array<i64: 8, 128>}, {pipeline_mode = #tpu.pipeline_mode<synchronous>, transform_indices = @transform_1, window_bounds = array<i64: 128, 512>}, {pipeline_mode = #tpu.pipeline_mode<synchronous>, transform_indices = @transform_2, window_bounds = array<i64: 1, 512>}, {pipeline_mode = #tpu.pipeline_mode<synchronous>, transform_indices = @transform_3, window_bounds = array<i64: 512, 512>}, {pipeline_mode = #tpu.pipeline_mode<synchronous>, transform_indices = @transform_4, window_bounds = array<i64: 1, 512>}, {transform_indices = @transform_5, window_bounds = array<i64: 512, 256>}, {transform_indices = @transform_6, window_bounds = array<i64: 1, 256>}, {transform_indices = @transform_7, window_bounds = array<i64: 8, 256>}]} {
    %c0_i32 = arith.constant 0 : i32
    %0 = arith.cmpi eq, %arg1, %c0_i32 : i32
    %1 = arith.extui %0 : i1 to i32
    %c0_i32_0 = arith.constant 0 : i32
    %2 = arith.cmpi ne, %1, %c0_i32_0 : i32
    scf.if %2 {
      %c0_8 = arith.constant 0 : index
      %c0_9 = arith.constant 0 : index
      %10 = vector.load %arg2[%c0_8, %c0_9] : memref<8x128xbf16, #tpu.memory_space<vmem>>, vector<8x128xbf16>
      %c0_10 = arith.constant 0 : index
      %c0_11 = arith.constant 0 : index
      %11 = vector.load %arg3[%c0_10, %c0_11] : memref<128x512xbf16, #tpu.memory_space<vmem>>, vector<128x512xbf16>
      %cst_12 = arith.constant dense<0.000000e+00> : vector<8x512xf32>
      %12 = tpu.matmul %10, %11, %cst_12 {dimension_numbers = #tpu.dot_dimension_numbers<[1], [0], [0], [1], [0, 0, 1, 1], [], []>} : vector<8x128xbf16>, vector<128x512xbf16>, vector<8x512xf32> -> vector<8x512xf32>
      %c0_13 = arith.constant 0 : index
      %c0_14 = arith.constant 0 : index
      %13 = vector.load %arg4[%c0_13, %c0_14] : memref<1x512xf32, #tpu.memory_space<vmem>>, vector<1x512xf32>
      %14 = vector.broadcast %13 : vector<1x512xf32> to vector<8x512xf32>
      %15 = arith.addf %12, %14 : vector<8x512xf32>
      %cst_15 = arith.constant 0.000000e+00 : f32
      %16 = vector.broadcast %cst_15 : f32 to vector<8x512xf32>
      %17 = arith.maximumf %15, %16 : vector<8x512xf32>
      %18 = arith.truncf %17 : vector<8x512xf32> to vector<8x512xbf16>
      %c0_16 = arith.constant 0 : index
      %c0_17 = arith.constant 0 : index
      %19 = vector.load %arg5[%c0_16, %c0_17] : memref<512x512xbf16, #tpu.memory_space<vmem>>, vector<512x512xbf16>
      %cst_18 = arith.constant dense<0.000000e+00> : vector<8x512xf32>
      %20 = tpu.matmul %18, %19, %cst_18 {dimension_numbers = #tpu.dot_dimension_numbers<[1], [0], [0], [1], [0, 0, 1, 1], [], []>} : vector<8x512xbf16>, vector<512x512xbf16>, vector<8x512xf32> -> vector<8x512xf32>
      %c0_19 = arith.constant 0 : index
      %c0_20 = arith.constant 0 : index
      %21 = vector.load %arg6[%c0_19, %c0_20] : memref<1x512xf32, #tpu.memory_space<vmem>>, vector<1x512xf32>
      %22 = vector.broadcast %21 : vector<1x512xf32> to vector<8x512xf32>
      %23 = arith.addf %20, %22 : vector<8x512xf32>
      %cst_21 = arith.constant 0.000000e+00 : f32
      %24 = vector.broadcast %cst_21 : f32 to vector<8x512xf32>
      %25 = arith.maximumf %23, %24 : vector<8x512xf32>
      %26 = arith.truncf %25 : vector<8x512xf32> to vector<8x512xbf16>
      %c0_22 = arith.constant 0 : index
      %c0_23 = arith.constant 0 : index
      %27 = vector.load %arg10[%c0_22, %c0_23] : memref<8x512xbf16, #tpu.memory_space<vmem>>, vector<8x512xbf16>
      tpu.vector_store %arg10[%c0_22, %c0_23], %26 {strides = array<i32>} : memref<8x512xbf16, #tpu.memory_space<vmem>>, vector<8x512xbf16>,
    } else {
    }
    %c0 = arith.constant 0 : index
    %c0_1 = arith.constant 0 : index
    %3 = vector.load %arg10[%c0, %c0_1] : memref<8x512xbf16, #tpu.memory_space<vmem>>, vector<8x512xbf16>
    %c0_2 = arith.constant 0 : index
    %c0_3 = arith.constant 0 : index
    %4 = vector.load %arg7[%c0_2, %c0_3] : memref<512x256xbf16, #tpu.memory_space<vmem>>, vector<512x256xbf16>
    %cst = arith.constant dense<0.000000e+00> : vector<8x256xf32>
    %5 = tpu.matmul %3, %4, %cst {dimension_numbers = #tpu.dot_dimension_numbers<[1], [0], [0], [1], [0, 0, 1, 1], [], []>} : vector<8x512xbf16>, vector<512x256xbf16>, vector<8x256xf32> -> vector<8x256xf32>
    %c0_4 = arith.constant 0 : index
    %c0_5 = arith.constant 0 : index
    %6 = vector.load %arg8[%c0_4, %c0_5] : memref<1x256xf32, #tpu.memory_space<vmem>>, vector<1x256xf32>
    %7 = vector.broadcast %6 : vector<1x256xf32> to vector<8x256xf32>
    %8 = arith.addf %5, %7 : vector<8x256xf32>
    %c0_6 = arith.constant 0 : index
    %c0_7 = arith.constant 0 : index
    %9 = vector.load %arg9[%c0_6, %c0_7] : memref<8x256xf32, #tpu.memory_space<vmem>>, vector<8x256xf32>
    tpu.vector_store %arg9[%c0_6, %c0_7], %8 {strides = array<i32>} : memref<8x256xf32, #tpu.memory_space<vmem>>, vector<8x256xf32>,
    return
  }
  func.func @transform_0(%arg0: i32, %arg1: i32) -> (i32, i32) {
    %c0_i32 = arith.constant 0 : i32
    %c0_i32_0 = arith.constant 0 : i32
    return %arg0, %c0_i32 : i32, i32
  }
  func.func @transform_1(%arg0: i32, %arg1: i32) -> (i32, i32) {
    %c0_i32 = arith.constant 0 : i32
    %c0_i32_0 = arith.constant 0 : i32
    %c0_i32_1 = arith.constant 0 : i32
    return %c0_i32, %c0_i32_0 : i32, i32
  }
  func.func @transform_2(%arg0: i32, %arg1: i32) -> (i32, i32) {
    %c0_i32 = arith.constant 0 : i32
    %c0_i32_0 = arith.constant 0 : i32
    %c0_i32_1 = arith.constant 0 : i32
    return %c0_i32, %c0_i32_0 : i32, i32
  }
  func.func @transform_3(%arg0: i32, %arg1: i32) -> (i32, i32) {
    %c0_i32 = arith.constant 0 : i32
    %c0_i32_0 = arith.constant 0 : i32
    %c0_i32_1 = arith.constant 0 : i32
    return %c0_i32, %c0_i32_0 : i32, i32
  }
  func.func @transform_4(%arg0: i32, %arg1: i32) -> (i32, i32) {
    %c0_i32 = arith.constant 0 : i32
    %c0_i32_0 = arith.constant 0 : i32
    %c0_i32_1 = arith.constant 0 : i32
    return %c0_i32, %c0_i32_0 : i32, i32
  }
  func.func @transform_5(%arg0: i32, %arg1: i32) -> (i32, i32) {
    %c0_i32 = arith.constant 0 : i32
    %c0_i32_0 = arith.constant 0 : i32
    return %c0_i32, %arg1 : i32, i32
  }
  func.func @transform_6(%arg0: i32, %arg1: i32) -> (i32, i32) {
    %c0_i32 = arith.constant 0 : i32
    %c0_i32_0 = arith.constant 0 : i32
    return %c0_i32, %arg1 : i32, i32
  }
  func.func @transform_7(%arg0: i32, %arg1: i32) -> (i32, i32) {
    %c0_i32 = arith.constant 0 : i32
    return %arg0, %arg1 : i32, i32
  }
}

</mosaic_0001>

<bundles_post_ra>
// kernel: multitask_forward.2
= control target key start
LH: loop header
LB: loop body
LE: loop exit
PB: predicated region body
PF: predicated region fallthrough
CT: control target
= control target key end

     0   :  { %8 = vsyncpa [#allocation3], 0  ;;  %s1418_s0 = inlined_call_operand.hbm [shape: f32[512,128], index: 0, kind: input, shape index: {}]   ;;  %s1419_s1 = inlined_call_operand.hbm [shape: bf16[128,128], index: 1, kind: input, shape index: {}]   ;;  %s1420_s2 = inlined_call_operand.vmem [shape: f32[1,128], index: 2, kind: input, shape index: {}]   ;;  %s1421_s3 = inlined_call_operand.vmem [shape: bf16[512,128], index: 3, kind: output, shape index: {}]  }
   0x1   :  { %10 = vsyncpa [#allocation3 + $0x1], 0 }
   0x2   :  { %11 = vsyncpa [#allocation5], 0  ;;  %s1184_s12 = smov 0   ;;  %s1186_s13 = smov 0  }
   0x3   :  { %s1188_s14 = smov 0   ;;  %s1190_s15 = smov 0  }
   0x4 LB: > { %s726_s16 = sadd.s32 4294967295, %s1156_s15   ;;  %p37_p0 = scmp.ne.s32.totalorder %s1148_s13, %s1144_s12  ;;  %s1156_s15 = sphi %s1190_s15, %s1437_s15   ;;  %s1152_s14 = sphi %s1188_s14, %s1436_s14   ;;  %s1148_s13 = sphi %s1186_s13, %s1435_s13   ;;  %s1144_s12 = sphi %s1184_s12, %s1434_s12  }
   0x5   : > { %p1206_p1 = scmp.eq.s32.totalorder %s726_s16, 0  ;;  %p728_p2 = scmp.ge.s32.totalorder %s1156_s15, 1 }
   0x6   : > { %p116_p3 = scmp.lt.s32.totalorder %s1156_s15, 3  ;;  %s1158_s20 = smov [#allocation4]  }
   0x7   : > { %s1426_s17 = scalar_select %p1206_p1, 1, 0 }
   0x8   : > { %p1214_p4 = por %p1206_p1, %p37_p0  ;;  %p1218_p5 = pnand %p728_p2, %p116_p3 }
   0x9   : > { %s128_s21 = sshll.u32 %s1158_s20, 4  ;;  %s1231_s23 = sadd.s32 1, %s1156_s15   ;;  %s129_s21 = int_to_ptr.vmem [resolvable:$true] %s128_s21 }
   0xa   : > { %s1427_s18 = scalar_select %p1214_p4, 1, 0 }
   0xb   : > { %s1428_s19 = scalar_select %p1218_p5, 1, 0 }
   0xc   : > { %p1004_p6 = pneg %p1218_p5  ;;  %s24_s24 = sadd.s32 1, %s1152_s14 }
   0xd   : > { %s21_s25 = ssub.s32 %s1156_s15, %s1231_s23  ;;  %s1060_s28 = scalar_lea.hbm %s1419_s1, 1024 }
   0xe   : > { %p1226_p7 = pnand %p1004_p6, %p1206_p1  ;;  %p1061_p8 = scmp.ne.s32.totalorder %s1419_s1, %s1060_s28 }
   0xf   : > { %p1067_p12 = scmp.lt.u32.totalorder %s1060_s28, %s1419_s1 }
  0x10   : > { %p1062_p9 = pneg %p1226_p7 }
  0x12   : > { %p1063_p10 = pnand %p1062_p9, %p1061_p8 }
  0x14   : > { %p1064_p11 = pneg %p1063_p10 }
  0x16   : > { %p1069_p13 = pnand %p1067_p12, %p1064_p11 }
  0x18   : > { %1072 = shalt.err (!%p1069_p13)
}
  0x19   : > { %s1073_s6 = scalar_lea.vmem %s129_s21, 1024  ;;  %p1081_p6 = scmp.lt.s32.totalorder %s129_s21, %s129_s21 }
  0x1a   : > { %p1074_p0 = scmp.ne.s32.totalorder %s129_s21, %s1073_s6  ;;  %p1082_p1 = scmp.lt.s32.totalorder %s1073_s6, %s1073_s6 }
  0x1c   : > { %p1076_p2 = pnand %p1074_p0, %p1062_p9  ;;  %p1083_p4 = por %p1082_p1, %p1081_p6 }
  0x1e   : > { %p1077_p3 = pneg %p1076_p2 }
  0x20   : > { %p1084_p5 = pnand %p1083_p4, %p1077_p3 }
  0x22   : > { %1087 = shalt.err (!%p1084_p5)
}
  0x23   : > { %s1159_s7 = smov 64   ;;  %s1160_s8 = smov 4  }
  0x24   : > { %1007 = dma.hbm_to_vmem [thread:$0]  (!%p1226_p7), %s1419_s1, 1024, %s129_s21, [#allocation5], %s1159_s7, %s1159_s7, %s1160_s8  }
  0x25   : > { %p22_p8 = scmp.eq.s32.totalorder %s21_s25, 0  ;;  %p31_p9 = scmp.ne.s32.totalorder %s1152_s14, %s1148_s13 }
  0x26   : > { %p32_p1 = scmp.eq.s32.totalorder %s1156_s15, 0  ;;  %p1013_p4 = scmp.lt.s32.totalorder %s1156_s15, 2 }
  0x27   : > { %s1257_s11 = scalar_select %p22_p8, %s1152_s14, %s24_s24  }
  0x28   : > { %p33_p5 = por %p32_p1, %p31_p9  ;;  %s145_s12 = sand.u32 1, %s1152_s14  }
  0x29   : > { %s731_s20 = sshll.u32 %s145_s12, 8  ;;  %s782_s26 = sshll.u32 %s1156_s15, 12 }
  0x2a   : > { %s1264_s29 = scalar_lea.hbm %s1418_s0, %s782_s26  ;;  %s149_s21 = scalar_lea.vmem [#allocation2], %s731_s20 }
  0x2b   : > { %s156_s22 = sshll.u32 %s149_s21, 4  ;;  %p1268_p7 = pnand %p1013_p4, %p33_p5  ;;  %s1266_s22 = int_to_ptr.vmem [resolvable:$true] %s156_s22 }
  0x2c   : > { %s1272_s25 = scalar_lea.sflag [#allocation3], %s145_s12  ;;  %s1088_s30 = scalar_lea.hbm %s1264_s29, 4096 }
  0x2d   : > { %p1089_p10 = scmp.ne.s32.totalorder %s1264_s29, %s1088_s30  ;;  %p1090_p11 = pneg %p1268_p7 }
  0x2e   : > { %s1093_s6 = scalar_lea.hbm %s1418_s0, 8192  ;;  %p1094_p0 = scmp.lt.u32.totalorder %s1264_s29, %s1418_s0 }
  0x2f   : > { %p1091_p12 = pnand %p1090_p11, %p1089_p10  ;;  %p1095_p2 = scmp.lt.u32.totalorder %s1093_s6, %s1088_s30 }
  0x30   : > { %p1097_p6 = scmp.lt.u32.totalorder %s1088_s30, %s1264_s29 }
  0x31   : > { %p1092_p13 = pneg %p1091_p12  ;;  %p1096_p3 = por %p1095_p2, %p1094_p0 }
  0x33   : > { %p1098_p8 = por %p1097_p6, %p1096_p3 }
  0x35   : > { %p1099_p9 = pnand %p1098_p8, %p1092_p13 }
  0x37   : > { %1102 = shalt.err (!%p1099_p9)
}
  0x38   : > { %s1103_s9 = scalar_lea.vmem %s1266_s22, 4096  ;;  %s1161_s10 = smov [#allocation2]  }
  0x39   : > { %p1104_p1 = scmp.ne.s32.totalorder %s1266_s22, %s1103_s9  ;;  %s1108_s12 = sshll.u32 %s1161_s10, 4  ;;  %s1109_s12 = int_to_ptr.vmem [resolvable:$false] %s1108_s12 }
  0x3a   : > { %s1110_s20 = scalar_lea.vmem %s1109_s12, 8192  ;;  %p1111_p10 = scmp.lt.s32.totalorder %s1266_s22, %s1109_s12 }
  0x3b   : > { %p1106_p4 = pnand %p1104_p1, %p1090_p11  ;;  %p1112_p12 = scmp.lt.s32.totalorder %s1110_s20, %s1103_s9 }
  0x3d   : > { %p1107_p5 = pneg %p1106_p4  ;;  %p1113_p0 = por %p1112_p12, %p1111_p10 }
  0x3f   : > { %p1114_p2 = pnand %p1113_p0, %p1107_p5 }
  0x41   : > { %1117 = shalt.err (!%p1114_p2)
}
  0x42   : > { %s1162_s26 = smov 128   ;;  %s1163_s27 = smov 8  }
  0x43   : > { %1011 = dma.hbm_to_vmem [thread:$0]  (!%p1268_p7), %s1264_s29, 4096, %s1266_s22, %s1272_s25, %s1162_s26, %s1162_s26, %s1163_s27  }
  0x44   : > { %p1431_p11 = scmp.ne.s32.totalorder %s1428_s19, 0 }
  0x45   : > { %s170_s28 = sand.u32 (!%p1431_p11), 1, %s1148_s13   ;;  %p1432_p13 = scmp.ne.s32.totalorder (!%p1431_p11), %s1427_s18, 0 }
  0x46   : > { %168 = sbr.rel (%p1431_p11) target bundleno = 358 (0x166), region = 32  ;;  %s735_s21 = sshll.u32 (!%p1431_p11), %s170_s28, 8 }
  0x47   : > { %s171_s30 = scalar_lea.sflag (!%p1431_p11), [#allocation3], %s170_s28  ;;  %s1303_s4 = scalar_lea.vmem (!%p1431_p11), [#allocation2], %s735_s21 }
  0x4d   : > { %1135 = dma.done.wait (%p1432_p13), %s171_s30, 4096  }
  0x4e   : > { %1137 = vsyncadd (%p1432_p13), %s171_s30, 4294963200  ;;  %p1433_p3 = scmp.ne.s32.totalorder %s1426_s17, 0 }
  0x50   : > { %1139 = dma.done.wait (%p1433_p3), [#allocation5], 1024  }
  0x51   : > { %1141 = vsyncadd (%p1433_p3), [#allocation5], 4294966272  ;;  %v1052_v0 = vld [vmem:[#allocation4] sm:$0xff]   ;;  %v1053_v1 = vld [vmem:[#allocation4 + $0x8] sm:$0xff]   ;;  %s737_s17 = sshll.u32 %s726_s16, 5 }
  0x52   : > { %934 = vmatprep.subr.bf16.mxu0 %v1052_v0  ;;  %982 = vmatprep.subr.bf16.mxu1 %v1052_v0  ;;  %v1054_v2 = vld [vmem:[#allocation4 + $0x10] sm:$0xff]   ;;  %v1055_v3 = vld [vmem:[#allocation4 + $0x18] sm:$0xff]   ;;  %v209_v4 = vld [vmem:[%s1303_s4] sm:$0xff]  ;;  %p203_p7 = scmp.lt.s32.totalorder %s737_s17, 63 }
  0x53   : > { %935 = vmatpush3.bf16.msra.mxu0 %v1052_v0  ;;  %990 = vmatpush3.bf16.msra.mxu1 %v1052_v0  ;;  %v210_v5 = vld [vmem:[%s1303_s4 + $0x8] sm:$0xff]  ;;  %v225_v6 = vld [vmem:[%s1303_s4 + $0x80] sm:$0xff]  ;;  %v1058_v12 = vld [vmem:[#allocation4 + $0x30] sm:$0xff]  }
  0x54   : > { %936 = vmatprep.subr.bf16.mxu0 %v1053_v1  ;;  %983 = vmatprep.subr.bf16.mxu1 %v1053_v1  ;;  %v241_v7 = vpack.c.bf16 %v210_v5, %v209_v4  ;;  %v226_v8 = vld [vmem:[%s1303_s4 + $0x88] sm:$0xff]  ;;  %v1056_v10 = vld [vmem:[#allocation4 + $0x20] sm:$0xff]   ;;  %v1059_v13 = vld [vmem:[#allocation4 + $0x38] sm:$0xff]   ;;  %s1439_s17 = smov (!%p203_p7, %s737_s17), 63 }
  0x55   : > { %v249_v9 = vpack.c.bf16 %v226_v8, %v225_v6  ;;  %v1057_v11 = vld [vmem:[#allocation4 + $0x28] sm:$0xff]   ;;  %v211_v14 = vld [vmem:[%s1303_s4 + $0x10] sm:$0xff]  ;;  %v212_v15 = vld [vmem:[%s1303_s4 + $0x18] sm:$0xff]  ;;  %s738_s29 = sshll.u32 %s1439_s17, 2 }
  0x56   : > { %950 = vmatprep.mubr.bf16.mxu0 %v241_v7  ;;  %v227_v16 = vld [vmem:[%s1303_s4 + $0x90] sm:$0xff]  ;;  %v228_v17 = vld [vmem:[%s1303_s4 + $0x98] sm:$0xff]  ;;  %v213_v18 = vld [vmem:[%s1303_s4 + $0x20] sm:$0xff]  ;;  %v242_v22 = vpack.c.bf16 %v212_v15, %v211_v14  ;;  %s1361_s22 = scalar_lea.vmem %s1421_s3, %s738_s29 }
  0x57   : > { %937 = vmatpush3.bf16.msra.mxu0 %v1053_v1  ;;  %991 = vmatpush3.bf16.msra.mxu1 %v1053_v1  ;;  %v214_v19 = vld [vmem:[%s1303_s4 + $0x28] sm:$0xff]  ;;  %v229_v20 = vld [vmem:[%s1303_s4 + $0xa0] sm:$0xff]  ;;  %v250_v23 = vpack.c.bf16 %v228_v17, %v227_v16  ;;  %v215_v26 = vld [vmem:[%s1303_s4 + $0x30] sm:$0xff] }
  0x58   : > { %938 = vmatprep.subr.bf16.mxu0 %v1054_v2  ;;  %984 = vmatprep.subr.bf16.mxu1 %v1054_v2  ;;  %v230_v21 = vld [vmem:[%s1303_s4 + $0xa8] sm:$0xff]  ;;  %v243_v24 = vpack.c.bf16 %v214_v19, %v213_v18  ;;  %v216_v27 = vld [vmem:[%s1303_s4 + $0x38] sm:$0xff]  ;;  %v231_v28 = vld [vmem:[%s1303_s4 + $0xb0] sm:$0xff] }
  0x59   : > { %966 = vmatprep.mubr.bf16.mxu1 %v249_v9  ;;  %v251_v25 = vpack.c.bf16 %v230_v21, %v229_v20  ;;  %v232_v29 = vld [vmem:[%s1303_s4 + $0xb8] sm:$0xff]  ;;  %v217_v30 = vld [vmem:[%s1303_s4 + $0x40] sm:$0xff]  ;;  %v218_v31 = vld [vmem:[%s1303_s4 + $0x48] sm:$0xff]  ;;  %v244_v34 = vpack.c.bf16 %v216_v27, %v215_v26 }
  0x5a   : > { %v233_v32 = vld [vmem:[%s1303_s4 + $0xc0] sm:$0xff]  ;;  %v234_v33 = vld [vmem:[%s1303_s4 + $0xc8] sm:$0xff]  ;;  %v252_v35 = vpack.c.bf16 %v232_v29, %v231_v28  ;;  %v245_v36 = vpack.c.bf16 %v218_v31, %v217_v30  ;;  %v219_v38 = vld [vmem:[%s1303_s4 + $0x50] sm:$0xff] }
  0x5b   : > { %939 = vmatpush3.bf16.msra.mxu0 %v1054_v2  ;;  %992 = vmatpush3.bf16.msra.mxu1 %v1054_v2  ;;  %v253_v37 = vpack.c.bf16 %v234_v33, %v233_v32  ;;  %v220_v39 = vld [vmem:[%s1303_s4 + $0x58] sm:$0xff]  ;;  %v235_v40 = vld [vmem:[%s1303_s4 + $0xd0] sm:$0xff]  ;;  %v221_v42 = vld [vmem:[%s1303_s4 + $0x60] sm:$0xff] }
  0x5c   : > { %940 = vmatprep.subr.bf16.mxu0 %v1055_v3  ;;  %985 = vmatprep.subr.bf16.mxu1 %v1055_v3  ;;  %v236_v41 = vld [vmem:[%s1303_s4 + $0xd8] sm:$0xff]  ;;  %v222_v43 = vld [vmem:[%s1303_s4 + $0x68] sm:$0xff]  ;;  %v237_v44 = vld [vmem:[%s1303_s4 + $0xe0] sm:$0xff]  ;;  %v246_v46 = vpack.c.bf16 %v220_v39, %v219_v38 }
  0x5d   : > { %v238_v45 = vld [vmem:[%s1303_s4 + $0xe8] sm:$0xff]  ;;  %v254_v47 = vpack.c.bf16 %v236_v41, %v235_v40  ;;  %v247_v48 = vpack.c.bf16 %v222_v43, %v221_v42  ;;  %v223_v50 = vld [vmem:[%s1303_s4 + $0x70] sm:$0xff]  ;;  %v224_v51 = vld [vmem:[%s1303_s4 + $0x78] sm:$0xff] }
  0x5e   : > { %v255_v49 = vpack.c.bf16 %v238_v45, %v237_v44  ;;  %v239_v52 = vld [vmem:[%s1303_s4 + $0xf0] sm:$0xff]  ;;  %v240_v53 = vld [vmem:[%s1303_s4 + $0xf8] sm:$0xff]  ;;  %v248_v54 = vpack.c.bf16 %v224_v51, %v223_v50  ;;  %v1350_v57 = vld [vmem:[%s1420_s2] ss:$0 sm:$0xff] }
  0x5f   : > { %941 = vmatpush3.bf16.msra.mxu0 %v1055_v3  ;;  %993 = vmatpush3.bf16.msra.mxu1 %v1055_v3  ;;  %v256_v55 = vpack.c.bf16 %v240_v53, %v239_v52 }
  0x60   : > { %942 = vmatprep.subr.bf16.mxu0 %v1056_v10  ;;  %986 = vmatprep.subr.bf16.mxu1 %v1056_v10 }
  0x63   : > { %943 = vmatpush3.bf16.msra.mxu0 %v1056_v10  ;;  %994 = vmatpush3.bf16.msra.mxu1 %v1056_v10 }
  0x64   : > { %944 = vmatprep.subr.bf16.mxu0 %v1057_v11  ;;  %987 = vmatprep.subr.bf16.mxu1 %v1057_v11 }
  0x67   : > { %945 = vmatpush3.bf16.msra.mxu0 %v1057_v11  ;;  %995 = vmatpush3.bf16.msra.mxu1 %v1057_v11 }
  0x68   : > { %946 = vmatprep.subr.bf16.mxu0 %v1058_v12  ;;  %988 = vmatprep.subr.bf16.mxu1 %v1058_v12 }
  0x6b   : > { %947 = vmatpush3.bf16.msra.mxu0 %v1058_v12  ;;  %996 = vmatpush3.bf16.msra.mxu1 %v1058_v12 }
  0x6c   : > { %948 = vmatprep.subr.bf16.mxu0 %v1059_v13  ;;  %989 = vmatprep.subr.bf16.mxu1 %v1059_v13 }
  0x6f   : > { %949 = vmatpush3.bf16.msra.mxu0 %v1059_v13  ;;  %997 = vmatpush3.bf16.msra.mxu1 %v1059_v13 }
  0x72   : > { %951 = vmatmul.mubr.bf16.vlgmr.msra.gmra.mrb[0].mxu0 %v242_v22  ;;  %967 = vmatmul.mubr.bf16.vlgmr.msra.gmra.mrb[0].mxu1 %v250_v23 }
  0x73   : > { %954 = vmatprep.mubr.bf16.mxu0 %v243_v24  ;;  %970 = vmatprep.mubr.bf16.mxu1 %v251_v25 }
  0x7a   : > { %955 = vmatmul.mubr.bf16.gmra.mrb[4].mxu0 %v244_v34  ;;  %971 = vmatmul.mubr.bf16.gmra.mrb[4].mxu1 %v252_v35 }
  0x7b   : > { %958 = vmatprep.mubr.bf16.mxu0 %v245_v36  ;;  %974 = vmatprep.mubr.bf16.mxu1 %v253_v37 }
  0x82   : > { %959 = vmatmul.mubr.bf16.gmra.mrb[8].mxu0 %v246_v46  ;;  %975 = vmatmul.mubr.bf16.gmra.mrb[8].mxu1 %v254_v47 }
  0x83   : > { %962 = vmatprep.mubr.bf16.mxu0 %v247_v48  ;;  %978 = vmatprep.mubr.bf16.mxu1 %v255_v49 }
  0x8a   : > { %963 = vmatmul.mubr.bf16.gmra.mrb[12].mxu0 %v248_v54  ;;  %979 = vmatmul.mubr.bf16.gmra.mrb[12].mxu1 %v256_v55 }
 0x145   : > { %v952_v56 = vpop.f32.mrb[0].mxu0  ;;  %v968_v58 = vpop.f32.mrb[0].mxu1 }
 0x146   : > { %v362_v59 = vpop.f32.mrb[1].mxu0  ;;  %v426_v60 = vpop.f32.mrb[1].mxu1  ;;  %v371_v63 = vadd.f32 %v952_v56, %v1350_v57  ;;  %v435_v0 = vadd.f32 %v968_v58, %v1350_v57 }
 0x147   : > { %v953_v61 = vpop.f32.mrb[2].mxu0  ;;  %v969_v62 = vpop.f32.mrb[2].mxu1  ;;  %v363_v5 = vadd.f32 %v1350_v57, %v362_v59  ;;  %v427_v6 = vadd.f32 %v1350_v57, %v426_v60 }
 0x148   : > { %v374_v1 = vadd.f32 %v953_v61, %v1350_v57  ;;  %v438_v2 = vadd.f32 %v969_v62, %v1350_v57  ;;  %v365_v3 = vpop.f32.mrb[3].mxu0  ;;  %v429_v4 = vpop.f32.mrb[3].mxu1 }
 0x149   : > { %v366_v7 = vadd.f32 %v1350_v57, %v365_v3  ;;  %v430_v8 = vadd.f32 %v1350_v57, %v429_v4 }
 0x14a   : > { %v823_v9 = vpack.c.bf16 %v374_v1, %v371_v63  ;;  %v863_v10 = vpack.c.bf16 %v438_v2, %v435_v0 }
 0x14b   : > { %v818_v11 = vpack.c.bf16 %v366_v7, %v363_v5  ;;  %v858_v12 = vpack.c.bf16 %v430_v8, %v427_v6 }
 0x14c   : > { %895 = vst [vmem:[%s1361_s22 + $0x8] sm:$0xff] %v823_v9   ;;  %903 = vst [vmem:[%s1361_s22 + $0x48] sm:$0xff] %v863_v10  }
 0x14d   : > { %819 = vst [vmem:[%s1361_s22] sm:$0xff] %v818_v11   ;;  %902 = vst [vmem:[%s1361_s22 + $0x40] sm:$0xff] %v858_v12   ;;  %v956_v13 = vpop.f32.mrb[4].mxu0  ;;  %v972_v14 = vpop.f32.mrb[4].mxu1 }
 0x14e   : > { %v378_v15 = vpop.f32.mrb[5].mxu0  ;;  %v442_v16 = vpop.f32.mrb[5].mxu1  ;;  %v387_v19 = vadd.f32 %v956_v13, %v1350_v57  ;;  %v451_v20 = vadd.f32 %v972_v14, %v1350_v57 }
 0x14f   : > { %v957_v17 = vpop.f32.mrb[6].mxu0  ;;  %v973_v18 = vpop.f32.mrb[6].mxu1  ;;  %v379_v25 = vadd.f32 %v1350_v57, %v378_v15  ;;  %v443_v26 = vadd.f32 %v1350_v57, %v442_v16 }
 0x150   : > { %v390_v21 = vadd.f32 %v957_v17, %v1350_v57  ;;  %v454_v22 = vadd.f32 %v973_v18, %v1350_v57  ;;  %v381_v23 = vpop.f32.mrb[7].mxu0  ;;  %v445_v24 = vpop.f32.mrb[7].mxu1 }
 0x151   : > { %v382_v27 = vadd.f32 %v1350_v57, %v381_v23  ;;  %v446_v28 = vadd.f32 %v1350_v57, %v445_v24 }
 0x152   : > { %v833_v29 = vpack.c.bf16 %v390_v21, %v387_v19  ;;  %v873_v30 = vpack.c.bf16 %v454_v22, %v451_v20 }
 0x153   : > { %v828_v31 = vpack.c.bf16 %v382_v27, %v379_v25  ;;  %v868_v32 = vpack.c.bf16 %v446_v28, %v443_v26 }
 0x154   : > { %897 = vst [vmem:[%s1361_s22 + $0x18] sm:$0xff] %v833_v29   ;;  %905 = vst [vmem:[%s1361_s22 + $0x58] sm:$0xff] %v873_v30  }
 0x155   : > { %896 = vst [vmem:[%s1361_s22 + $0x10] sm:$0xff] %v828_v31   ;;  %904 = vst [vmem:[%s1361_s22 + $0x50] sm:$0xff] %v868_v32   ;;  %v960_v33 = vpop.f32.mrb[8].mxu0  ;;  %v976_v34 = vpop.f32.mrb[8].mxu1 }
 0x156   : > { %v394_v35 = vpop.f32.mrb[9].mxu0  ;;  %v458_v36 = vpop.f32.mrb[9].mxu1  ;;  %v403_v39 = vadd.f32 %v960_v33, %v1350_v57  ;;  %v467_v40 = vadd.f32 %v976_v34, %v1350_v57 }
 0x157   : > { %v961_v37 = vpop.f32.mrb[10].mxu0  ;;  %v977_v38 = vpop.f32.mrb[10].mxu1  ;;  %v395_v45 = vadd.f32 %v1350_v57, %v394_v35  ;;  %v459_v46 = vadd.f32 %v1350_v57, %v458_v36 }
 0x158   : > { %v406_v41 = vadd.f32 %v961_v37, %v1350_v57  ;;  %v470_v42 = vadd.f32 %v977_v38, %v1350_v57  ;;  %v397_v43 = vpop.f32.mrb[11].mxu0  ;;  %v461_v44 = vpop.f32.mrb[11].mxu1 }
 0x159   : > { %v398_v47 = vadd.f32 %v1350_v57, %v397_v43  ;;  %v462_v48 = vadd.f32 %v1350_v57, %v461_v44 }
 0x15a   : > { %v843_v49 = vpack.c.bf16 %v406_v41, %v403_v39  ;;  %v883_v50 = vpack.c.bf16 %v470_v42, %v467_v40 }
 0x15b   : > { %v838_v51 = vpack.c.bf16 %v398_v47, %v395_v45  ;;  %v878_v52 = vpack.c.bf16 %v462_v48, %v459_v46 }
 0x15c   : > { %899 = vst [vmem:[%s1361_s22 + $0x28] sm:$0xff] %v843_v49   ;;  %907 = vst [vmem:[%s1361_s22 + $0x68] sm:$0xff] %v883_v50  }
 0x15d   : > { %898 = vst [vmem:[%s1361_s22 + $0x20] sm:$0xff] %v838_v51   ;;  %906 = vst [vmem:[%s1361_s22 + $0x60] sm:$0xff] %v878_v52   ;;  %v964_v53 = vpop.f32.mrb[12].mxu0  ;;  %v980_v54 = vpop.f32.mrb[12].mxu1 }
 0x15e   : > { %v410_v55 = vpop.f32.mrb[13].mxu0  ;;  %v474_v56 = vpop.f32.mrb[13].mxu1  ;;  %v419_v60 = vadd.f32 %v964_v53, %v1350_v57  ;;  %v483_v61 = vadd.f32 %v980_v54, %v1350_v57 }
 0x15f   : > { %v965_v58 = vpop.f32.mrb[14].mxu0  ;;  %v981_v59 = vpop.f32.mrb[14].mxu1  ;;  %v411_v2 = vadd.f32 %v1350_v57, %v410_v55  ;;  %v475_v3 = vadd.f32 %v1350_v57, %v474_v56 }
 0x160   : > { %v422_v62 = vadd.f32 %v965_v58, %v1350_v57  ;;  %v486_v63 = vadd.f32 %v981_v59, %v1350_v57  ;;  %v413_v0 = vpop.f32.mrb[15].mxu0  ;;  %v477_v1 = vpop.f32.mrb[15].mxu1 }
 0x161   : > { %v414_v4 = vadd.f32 %v1350_v57, %v413_v0  ;;  %v478_v5 = vadd.f32 %v1350_v57, %v477_v1 }
 0x162   : > { %v853_v6 = vpack.c.bf16 %v422_v62, %v419_v60  ;;  %v893_v7 = vpack.c.bf16 %v486_v63, %v483_v61 }
 0x163   : > { %v848_v8 = vpack.c.bf16 %v414_v4, %v411_v2  ;;  %v888_v9 = vpack.c.bf16 %v478_v5, %v475_v3 }
 0x164   : > { %901 = vst [vmem:[%s1361_s22 + $0x38] sm:$0xff] %v853_v6   ;;  %909 = vst [vmem:[%s1361_s22 + $0x78] sm:$0xff] %v893_v7  }
 0x165   : > { %900 = vst [vmem:[%s1361_s22 + $0x30] sm:$0xff] %v848_v8   ;;  %908 = vst [vmem:[%s1361_s22 + $0x70] sm:$0xff] %v888_v9  }
 0x166 PF: > { %p14_p6 = scmp.ge.s32.totalorder %s1231_s23, 4   ;;  %s1434_s12 = smov %s1148_s13 }
 0x167   : > { %s1435_s13 = smov %s1152_s14  ;;  %s1436_s14 = smov %s1257_s11 }
 0x168   : > { %s1437_s15 = smov %s1231_s23  ;;  %16 = sbr.rel (!%p14_p6) target bundleno = 4 (0x4), region = 76 }
 0x16f   :  { %671 = vsyncpa [#allocation3], 1 }
 0x170   :  { %673 = vsyncpa [#allocation3 + $0x1], 1 }
 0x171   :  { %674 = vsyncpa [#allocation5], 1 }

// kernel: multitask_forward.3
= control target key start
LH: loop header
LB: loop body
LE: loop exit
PB: predicated region body
PF: predicated region fallthrough
CT: control target
= control target key end

     0   :  { %12 = vsyncpa [#allocation4], 0  ;;  %s3842_s0 = inlined_call_operand.vmem [shape: bf16[16,128], index: 0, kind: input, shape index: {}]   ;;  %s3843_s1 = inlined_call_operand.vmem [shape: bf16[128,512], index: 1, kind: input, shape index: {}]   ;;  %s3844_s2 = inlined_call_operand.vmem [shape: f32[1,512], index: 2, kind: input, shape index: {}]   ;;  %s3845_s3 = inlined_call_operand.vmem [shape: bf16[512,512], index: 3, kind: input, shape index: {}]   ;;  %s3846_s4 = inlined_call_operand.vmem [shape: f32[1,512], index: 4, kind: input, shape index: {}]   ;;  %s3847_s5 = inlined_call_operand.vmem [shape: bf16[512,256], index: 5, kind: input, shape index: {}]   ;;  %s3848_s6 = inlined_call_operand.vmem [shape: f32[1,256], index: 6, kind: input, shape index: {}]   ;;  %s3849_s7 = inlined_call_operand.hbm [shape: f32[16,256], index: 7, kind: output, shape index: {}]  }
   0x1   :  { %14 = vsyncpa [#allocation4 + $0x1], 0  ;;  %s3007_s24 = smov 0   ;;  %s3009_s25 = smov 0  }
   0x2   :  { %s3011_s26 = smov 0   ;;  %s3013_s27 = smov 0  }
   0x3   :  { %s3015_s28 = smov 0   ;;  %s3017_s29 = smov 0  }
   0x4 LB: > { %s2226_s30 = sadd.s32 4294967295, %s2963_s29   ;;  %s2227_s8 = sadd.s32 4294967294, %s2963_s29   ;;  %s2963_s29 = sphi %s3017_s29, %s20_s29   ;;  %s2959_s28 = sphi %s3015_s28, %s3856_s28   ;;  %s2955_s27 = sphi %s3013_s27, %s3855_s27   ;;  %s2951_s26 = sphi %s3011_s26, %s3854_s26   ;;  %s2947_s25 = sphi %s3009_s25, %s3853_s25   ;;  %s2943_s24 = sphi %s3007_s24, %s3852_s24  }
   0x5   : > { %s32_s9 = sadd.s32 1, %s2959_s28  ;;  %s203_s10 = sadd.s32 1, %s2951_s26 }
   0x6   : > { %p34_p0 = scmp.ge.s32.totalorder %s32_s9, 2  ;;  %p213_p1 = scmp.ne.s32.totalorder %s2951_s26, %s2947_s25 }
   0x7   : > { %p214_p2 = scmp.eq.s32.totalorder %s2226_s30, 1  ;;  %p219_p3 = scmp.ne.s32.totalorder %s2947_s25, %s2943_s24 }
   0x8   : > { %s3858_s9 = smov (%p34_p0, %s32_s9), 0  ;;  %p220_p5 = scmp.eq.s32.totalorder %s2227_s8, 1 }
   0x9   : > { %p3047_p4 = por %p214_p2, %p213_p1  ;;  %s198_s12 = ssub.s32 %s2959_s28, %s3858_s9 }
   0xa   : > { %p2232_p6 = scmp.ge.s32.totalorder %s2963_s29, 1  ;;  %p201_p7 = scmp.eq.s32.totalorder %s198_s12, 0 }
   0xb   : > { %p3054_p8 = por %p220_p5, %p219_p3  ;;  %p274_p9 = scmp.lt.s32.totalorder %s2963_s29, 3 }
   0xc   : > { %s3060_s14 = scalar_select %p201_p7, %s2951_s26, %s203_s10  }
   0xd   : > { %p275_p10 = pnand %p2232_p6, %p274_p9 }
   0xe   : > { %v2549_v0 = vld [vmem:[%s3843_s1 + $0x4] ss:$16 sps:$4 sm:$0xff] (!%p275_p10)   ;;  %v2551_v1 = vld [vmem:[%s3843_s1] ss:$16 sps:$4 sm:$0xff] (!%p275_p10)   ;;  %v2965_v2 = vmov (!%p275_p10), 0   ;;  %p314_p11 = scmp.lt.s32.totalorder (!%p275_p10), %s2955_s27, 1 }
   0xf   : > { %278 = sbr.rel (%p275_p10) target bundleno = 845 (0x34d), region = 48  ;;  %582 = vmatprep.mubr.bf16.mxu0 (!%p275_p10), %v2965_v2  ;;  %623 = vmatprep.mubr.bf16.mxu1 (!%p275_p10), %v2965_v2  ;;  %v2552_v3 = vld [vmem:[%s3843_s1 + $0xc] ss:$16 sps:$4 sm:$0xff] (!%p275_p10)   ;;  %v2554_v4 = vld [vmem:[%s3843_s1 + $0x8] ss:$16 sps:$4 sm:$0xff] (!%p275_p10)   ;;  %s2472_s22 = sshll.u32 (!%p275_p10), %s2955_s27, 8 }
  0x10   : > { %550 = vmatprep.subr.bf16.mxu0 (!%p275_p10), %v2549_v0  ;;  %v2555_v5 = vld [vmem:[%s3843_s1 + $0x24] ss:$16 sps:$4 sm:$0xff] (!%p275_p10)   ;;  %v2557_v6 = vld [vmem:[%s3843_s1 + $0x20] ss:$16 sps:$4 sm:$0xff] (!%p275_p10)   ;;  %591 = vmatprep.subr.bf16.mxu1 (!%p275_p10), %v2552_v3  ;;  %v2558_v7 = vld [vmem:[%s3843_s1 + $0x2c] ss:$16 sps:$4 sm:$0xff] (!%p275_p10)   ;;  %s3795_s12 = scalar_lea.hbm (!%p275_p10), %s3849_s7, %s2472_s22 }
  0x11   : > { %551 = vmatpush1.bf16.msra.mxu0 (!%p275_p10), %v2551_v1  ;;  %592 = vmatpush1.bf16.msra.mxu1 (!%p275_p10), %v2554_v4  ;;  %v2560_v8 = vld [vmem:[%s3843_s1 + $0x28] ss:$16 sps:$4 sm:$0xff] (!%p275_p10)   ;;  %v2561_v9 = vld [vmem:[%s3843_s1 + $0x44] ss:$16 sps:$4 sm:$0xff] (!%p275_p10)   ;;  %v2563_v10 = vld [vmem:[%s3843_s1 + $0x40] ss:$16 sps:$4 sm:$0xff] (!%p275_p10)  }
  0x12   : > { %552 = vmatprep.subr.bf16.mxu0 (!%p275_p10), %v2555_v5  ;;  %593 = vmatprep.subr.bf16.mxu1 (!%p275_p10), %v2558_v7  ;;  %v2564_v11 = vld [vmem:[%s3843_s1 + $0x4c] ss:$16 sps:$4 sm:$0xff] (!%p275_p10)   ;;  %v2567_v12 = vld [vmem:[%s3843_s1 + $0x64] ss:$16 sps:$4 sm:$0xff] (!%p275_p10)   ;;  %v2566_v13 = vld [vmem:[%s3843_s1 + $0x48] ss:$16 sps:$4 sm:$0xff] (!%p275_p10)  }
  0x13   : > { %v2570_v14 = vld [vmem:[%s3843_s1 + $0x6c] ss:$16 sps:$4 sm:$0xff] (!%p275_p10)   ;;  %v2569_v15 = vld [vmem:[%s3843_s1 + $0x60] ss:$16 sps:$4 sm:$0xff] (!%p275_p10)   ;;  %v2573_v16 = vld [vmem:[%s3843_s1 + $0x84] ss:$16 sps:$4 sm:$0xff] (!%p275_p10)  }
  0x14   : > { %v2572_v17 = vld [vmem:[%s3843_s1 + $0x68] ss:$16 sps:$4 sm:$0xff] (!%p275_p10)   ;;  %v2576_v18 = vld [vmem:[%s3843_s1 + $0x8c] ss:$16 sps:$4 sm:$0xff] (!%p275_p10)   ;;  %v2575_v19 = vld [vmem:[%s3843_s1 + $0x80] ss:$16 sps:$4 sm:$0xff] (!%p275_p10)  }
  0x15   : > { %553 = vmatpush1.bf16.msra.mxu0 (!%p275_p10), %v2557_v6  ;;  %594 = vmatpush1.bf16.msra.mxu1 (!%p275_p10), %v2560_v8  ;;  %v2579_v20 = vld [vmem:[%s3843_s1 + $0xa4] ss:$16 sps:$4 sm:$0xff] (!%p275_p10)   ;;  %v2578_v21 = vld [vmem:[%s3843_s1 + $0x88] ss:$16 sps:$4 sm:$0xff] (!%p275_p10)   ;;  %v2582_v22 = vld [vmem:[%s3843_s1 + $0xac] ss:$16 sps:$4 sm:$0xff] (!%p275_p10)  }
  0x16   : > { %554 = vmatprep.subr.bf16.mxu0 %v2561_v9  ;;  %595 = vmatprep.subr.bf16.mxu1 %v2564_v11  ;;  %v2581_v23 = vld [vmem:[%s3843_s1 + $0xa0] ss:$16 sps:$4 sm:$0xff]   ;;  %v2585_v24 = vld [vmem:[%s3843_s1 + $0xc4] ss:$16 sps:$4 sm:$0xff]   ;;  %s315_s30 = scalar_select %p314_p11, %s2955_s27, 1 }
  0x17   : > { %v2584_v25 = vld [vmem:[%s3843_s1 + $0xa8] ss:$16 sps:$4 sm:$0xff]   ;;  %v2588_v26 = vld [vmem:[%s3843_s1 + $0xcc] ss:$16 sps:$4 sm:$0xff]   ;;  %v2587_v27 = vld [vmem:[%s3843_s1 + $0xc0] ss:$16 sps:$4 sm:$0xff]  }
  0x18   : > { %v2591_v28 = vld [vmem:[%s3843_s1 + $0xe4] ss:$16 sps:$4 sm:$0xff]   ;;  %s2234_s20 = sshll.u32 %s315_s30, 2  ;;  %v2590_v29 = vld [vmem:[%s3843_s1 + $0xc8] ss:$16 sps:$4 sm:$0xff]   ;;  %s311_s30 = sand.u32 1, %s2947_s25  }
  0x19   : > { %555 = vmatpush1.bf16.msra.mxu0 %v2563_v10  ;;  %596 = vmatpush1.bf16.msra.mxu1 %v2566_v13  ;;  %v2594_v30 = vld [vmem:[%s3843_s1 + $0xec] ss:$16 sps:$4 sm:$0xff]   ;;  %v2593_v31 = vld [vmem:[%s3843_s1 + $0xe0] ss:$16 sps:$4 sm:$0xff]   ;;  %s317_s17 = scalar_lea.vmem %s3842_s0, %s2234_s20  ;;  %v2602_v32 = vld [vmem:[%s3845_s3 + $0x204] ss:$16 sps:$4 sm:$0xff]  }
  0x1a   : > { %556 = vmatprep.subr.bf16.mxu0 %v2567_v12  ;;  %597 = vmatprep.subr.bf16.mxu1 %v2570_v14  ;;  %v2596_v33 = vld [vmem:[%s3843_s1 + $0xe8] ss:$16 sps:$4 sm:$0xff]   ;;  %v335_v34 = vld [vmem:[%s317_s17] sm:$0xf]  ;;  %v2599_v35 = vld [vmem:[%s3845_s3 + $0x4] ss:$16 sps:$4 sm:$0xff]  }
  0x1b   : > { %v2600_v36 = vld [vmem:[%s3845_s3 + $0x200] ss:$16 sps:$4 sm:$0xff]   ;;  %v2608_v37 = vld [vmem:[%s3845_s3 + $0x224] ss:$16 sps:$4 sm:$0xff]   ;;  %s2233_s18 = sshll.u32 %s311_s30, 4  ;;  %s2113_s27 = scalar_lea.sflag [#allocation4], %s311_s30 }
  0x1c   : > { %v2597_v38 = vld [vmem:[%s3845_s3] ss:$16 sps:$4 sm:$0xff]   ;;  %v2605_v39 = vld [vmem:[%s3845_s3 + $0x24] ss:$16 sps:$4 sm:$0xff]   ;;  %s313_s23 = scalar_lea.vmem [#allocation3], %s2233_s18  ;;  %s2966_s16 = smov [#allocation3]  }
  0x1d   : > { %557 = vmatpush1.bf16.msra.mxu0 %v2569_v15  ;;  %598 = vmatpush1.bf16.msra.mxu1 %v2572_v17  ;;  %v2606_v40 = vld [vmem:[%s3845_s3 + $0x220] ss:$16 sps:$4 sm:$0xff]   ;;  %v2614_v41 = vld [vmem:[%s3845_s3 + $0x244] ss:$16 sps:$4 sm:$0xff]   ;;  %s2129_s8 = sshll.u32 %s313_s23, 4  ;;  %s2889_s17 = sshll.u32 %s2966_s16, 4  ;;  %s3797_s8 = int_to_ptr.vmem [resolvable:$true] %s2129_s8  ;;  %s2890_s17 = int_to_ptr.vmem [resolvable:$false] %s2889_s17 }
  0x1e   : > { %558 = vmatprep.subr.bf16.mxu0 %v2573_v16  ;;  %599 = vmatprep.subr.bf16.mxu1 %v2576_v18  ;;  %v2603_v42 = vld [vmem:[%s3845_s3 + $0x20] ss:$16 sps:$4 sm:$0xff]   ;;  %v2611_v43 = vld [vmem:[%s3845_s3 + $0x44] ss:$16 sps:$4 sm:$0xff]   ;;  %s2885_s15 = scalar_lea.vmem %s3797_s8, 256  ;;  %s2891_s18 = scalar_lea.vmem %s2890_s17, 512 }
  0x1f   : > { %v2612_v44 = vld [vmem:[%s3845_s3 + $0x240] ss:$16 sps:$4 sm:$0xff]   ;;  %v2620_v45 = vld [vmem:[%s3845_s3 + $0x264] ss:$16 sps:$4 sm:$0xff]   ;;  %p2886_p12 = scmp.ne.s32.totalorder %s3797_s8, %s2885_s15  ;;  %p2892_p1 = scmp.lt.s32.totalorder %s3797_s8, %s2890_s17 }
  0x20   : > { %v2609_v46 = vld [vmem:[%s3845_s3 + $0x40] ss:$16 sps:$4 sm:$0xff]   ;;  %v2617_v47 = vld [vmem:[%s3845_s3 + $0x64] ss:$16 sps:$4 sm:$0xff]   ;;  %p2893_p2 = scmp.lt.s32.totalorder %s2891_s18, %s2885_s15 }
  0x21   : > { %559 = vmatpush1.bf16.msra.mxu0 %v2575_v19  ;;  %600 = vmatpush1.bf16.msra.mxu1 %v2578_v21  ;;  %v2618_v48 = vld [vmem:[%s3845_s3 + $0x260] ss:$16 sps:$4 sm:$0xff]   ;;  %v2626_v49 = vld [vmem:[%s3845_s3 + $0x284] ss:$16 sps:$4 sm:$0xff]   ;;  %p2887_p13 = pnand %p2886_p12, %p3047_p4 }
  0x22   : > { %560 = vmatprep.subr.bf16.mxu0 %v2579_v20  ;;  %601 = vmatprep.subr.bf16.mxu1 %v2582_v22  ;;  %v2615_v50 = vld [vmem:[%s3845_s3 + $0x60] ss:$16 sps:$4 sm:$0xff]   ;;  %v2623_v51 = vld [vmem:[%s3845_s3 + $0x84] ss:$16 sps:$4 sm:$0xff]   ;;  %p2894_p3 = por %p2893_p2, %p2892_p1 }
  0x23   : > { %v2624_v52 = vld [vmem:[%s3845_s3 + $0x280] ss:$16 sps:$4 sm:$0xff]   ;;  %v2632_v53 = vld [vmem:[%s3845_s3 + $0x2a4] ss:$16 sps:$4 sm:$0xff]   ;;  %p2888_p0 = pneg %p2887_p13 }
  0x24   : > { %v2621_v54 = vld [vmem:[%s3845_s3 + $0x80] ss:$16 sps:$4 sm:$0xff]   ;;  %v2629_v55 = vld [vmem:[%s3845_s3 + $0xa4] ss:$16 sps:$4 sm:$0xff]  }
  0x25   : > { %561 = vmatpush1.bf16.msra.mxu0 %v2581_v23  ;;  %602 = vmatpush1.bf16.msra.mxu1 %v2584_v25  ;;  %v2630_v56 = vld [vmem:[%s3845_s3 + $0x2a0] ss:$16 sps:$4 sm:$0xff]   ;;  %v2638_v57 = vld [vmem:[%s3845_s3 + $0x2c4] ss:$16 sps:$4 sm:$0xff]   ;;  %p2895_p5 = pnand %p2894_p3, %p2888_p0 }
  0x26   : > { %562 = vmatprep.subr.bf16.mxu0 %v2585_v24  ;;  %603 = vmatprep.subr.bf16.mxu1 %v2588_v26  ;;  %v2627_v58 = vld [vmem:[%s3845_s3 + $0xa0] ss:$16 sps:$4 sm:$0xff]   ;;  %v2635_v59 = vld [vmem:[%s3845_s3 + $0xc4] ss:$16 sps:$4 sm:$0xff]  }
  0x27   : > { %v2636_v60 = vld [vmem:[%s3845_s3 + $0x2c0] ss:$16 sps:$4 sm:$0xff]   ;;  %v2644_v61 = vld [vmem:[%s3845_s3 + $0x2e4] ss:$16 sps:$4 sm:$0xff]  }
  0x28   : > { %v2633_v62 = vld [vmem:[%s3845_s3 + $0xc0] ss:$16 sps:$4 sm:$0xff]   ;;  %v2641_v63 = vld [vmem:[%s3845_s3 + $0xe4] ss:$16 sps:$4 sm:$0xff]  }
  0x29   : > { %563 = vmatpush1.bf16.msra.mxu0 %v2587_v27  ;;  %604 = vmatpush1.bf16.msra.mxu1 %v2590_v29  ;;  %v2642_v0 = vld [vmem:[%s3845_s3 + $0x2e0] ss:$16 sps:$4 sm:$0xff]   ;;  %v2650_v2 = vld [vmem:[%s3845_s3 + $0x304] ss:$16 sps:$4 sm:$0xff]  }
  0x2a   : > { %564 = vmatprep.subr.bf16.mxu0 %v2591_v28  ;;  %605 = vmatprep.subr.bf16.mxu1 %v2594_v30  ;;  %v2639_v1 = vld [vmem:[%s3845_s3 + $0xe0] ss:$16 sps:$4 sm:$0xff]   ;;  %v2647_v3 = vld [vmem:[%s3845_s3 + $0x104] ss:$16 sps:$4 sm:$0xff]  }
  0x2b   : > { %v2648_v4 = vld [vmem:[%s3845_s3 + $0x300] ss:$16 sps:$4 sm:$0xff]   ;;  %v2656_v5 = vld [vmem:[%s3845_s3 + $0x324] ss:$16 sps:$4 sm:$0xff]  }
  0x2c   : > { %v2645_v6 = vld [vmem:[%s3845_s3 + $0x100] ss:$16 sps:$4 sm:$0xff]   ;;  %v2653_v7 = vld [vmem:[%s3845_s3 + $0x124] ss:$16 sps:$4 sm:$0xff]  }
  0x2d   : > { %565 = vmatpush1.bf16.msra.mxu0 %v2593_v31  ;;  %606 = vmatpush1.bf16.msra.mxu1 %v2596_v33  ;;  %v2654_v8 = vld [vmem:[%s3845_s3 + $0x320] ss:$16 sps:$4 sm:$0xff]   ;;  %v2662_v9 = vld [vmem:[%s3845_s3 + $0x344] ss:$16 sps:$4 sm:$0xff]  }
  0x2e   : > { %1471 = vmatprep.subr.bf16.mxu0 %v2602_v32  ;;  %1430 = vmatprep.subr.bf16.mxu1 %v2599_v35  ;;  %v2651_v10 = vld [vmem:[%s3845_s3 + $0x120] ss:$16 sps:$4 sm:$0xff]   ;;  %v2659_v11 = vld [vmem:[%s3845_s3 + $0x144] ss:$16 sps:$4 sm:$0xff]   ;;  %v370_v35 = vlaneseq }
  0x2f   : > { %v2660_v12 = vld [vmem:[%s3845_s3 + $0x340] ss:$16 sps:$4 sm:$0xff]   ;;  %v2668_v13 = vld [vmem:[%s3845_s3 + $0x364] ss:$16 sps:$4 sm:$0xff]  }
  0x30   : > { %583 = vmatmul.mubr.bf16.vlgmr.msra.gmra.mrb[0].mxu0 %v335_v34  ;;  %624 = vmatmul.mubr.bf16.vlgmr.msra.gmra.mrb[0].mxu1 %v335_v34  ;;  %v2657_v14 = vld [vmem:[%s3845_s3 + $0x140] ss:$16 sps:$4 sm:$0xff]   ;;  %v2665_v15 = vld [vmem:[%s3845_s3 + $0x164] ss:$16 sps:$4 sm:$0xff]   ;;  %v2695_v34 = vld [vmem:[%s3845_s3 + $0xc] ss:$16 sps:$4 sm:$0xff]  }
  0x31   : > { %1472 = vmatpush1.bf16.msra.mxu0 %v2600_v36  ;;  %1431 = vmatpush1.bf16.msra.mxu1 %v2597_v38  ;;  %v2666_v16 = vld [vmem:[%s3845_s3 + $0x360] ss:$16 sps:$4 sm:$0xff]   ;;  %v2674_v17 = vld [vmem:[%s3845_s3 + $0x384] ss:$16 sps:$4 sm:$0xff]   ;;  %v3358_v36 = vshrl.u32 %v370_v35, 7 }
  0x32   : > { %1473 = vmatprep.subr.bf16.mxu0 %v2608_v37  ;;  %1432 = vmatprep.subr.bf16.mxu1 %v2605_v39  ;;  %v2663_v18 = vld [vmem:[%s3845_s3 + $0x160] ss:$16 sps:$4 sm:$0xff]   ;;  %v2671_v19 = vld [vmem:[%s3845_s3 + $0x184] ss:$16 sps:$4 sm:$0xff]  }
  0x33   : > { %v2672_v20 = vld [vmem:[%s3845_s3 + $0x380] ss:$16 sps:$4 sm:$0xff]   ;;  %v2680_v21 = vld [vmem:[%s3845_s3 + $0x3a4] ss:$16 sps:$4 sm:$0xff]   ;;  %v3361_v37 = vsub.s32 0, %v3358_v36  ;;  %v3367_v39 = vsub.s32 1, %v3358_v36 }
  0x34   : > { %v2669_v22 = vld [vmem:[%s3845_s3 + $0x180] ss:$16 sps:$4 sm:$0xff]   ;;  %v2677_v23 = vld [vmem:[%s3845_s3 + $0x1a4] ss:$16 sps:$4 sm:$0xff]  }
  0x35   : > { %1474 = vmatpush1.bf16.msra.mxu0 %v2606_v40  ;;  %1433 = vmatpush1.bf16.msra.mxu1 %v2603_v42  ;;  %v2678_v24 = vld [vmem:[%s3845_s3 + $0x3a0] ss:$16 sps:$4 sm:$0xff]   ;;  %v2683_v26 = vld [vmem:[%s3845_s3 + $0x1c4] ss:$16 sps:$4 sm:$0xff]   ;;  %v380_v40 = vsub.s32 2, %v3358_v36 }
  0x36   : > { %1475 = vmatprep.subr.bf16.mxu0 %v2614_v41  ;;  %1434 = vmatprep.subr.bf16.mxu1 %v2611_v43  ;;  %v2675_v25 = vld [vmem:[%s3845_s3 + $0x1a0] ss:$16 sps:$4 sm:$0xff]   ;;  %v2686_v28 = vld [vmem:[%s3845_s3 + $0x3c4] ss:$16 sps:$4 sm:$0xff]   ;;  %v384_v41 = vsub.s32 3, %v3358_v36 }
  0x37   : > { %v2681_v27 = vld [vmem:[%s3845_s3 + $0x1c0] ss:$16 sps:$4 sm:$0xff]   ;;  %v2689_v30 = vld [vmem:[%s3845_s3 + $0x1e4] ss:$16 sps:$4 sm:$0xff]  }
  0x38   : > { %v2684_v29 = vld [vmem:[%s3845_s3 + $0x3c0] ss:$16 sps:$4 sm:$0xff]   ;;  %v2692_v32 = vld [vmem:[%s3845_s3 + $0x3e4] ss:$16 sps:$4 sm:$0xff]  }
  0x39   : > { %1476 = vmatpush1.bf16.msra.mxu0 %v2612_v44  ;;  %1435 = vmatpush1.bf16.msra.mxu1 %v2609_v46  ;;  %v2687_v31 = vld [vmem:[%s3845_s3 + $0x1e0] ss:$16 sps:$4 sm:$0xff]   ;;  %v2815_v35 = vld [vmem:[%s3847_s5 + $0x84] ss:$8 sps:$4 sm:$0xff]  }
  0x3a   : > { %1477 = vmatprep.subr.bf16.mxu0 %v2620_v45  ;;  %1436 = vmatprep.subr.bf16.mxu1 %v2617_v47  ;;  %v2690_v33 = vld [vmem:[%s3845_s3 + $0x3e0] ss:$16 sps:$4 sm:$0xff]  }
  0x3b   : > { %v368_v38 = vld [vmem:[%s3844_s2] sm:$0xf] }
  0x3c   : > { %v373_v42 = vrot.slane %v368_v38, %v3361_v37  ;;  %v377_v43 = vrot.slane %v368_v38, %v3367_v39  ;;  %v381_v44 = vrot.slane %v368_v38, %v380_v40  ;;  %v385_v46 = vrot.slane %v368_v38, %v384_v41  ;;  %v2722_v38 = vld [vmem:[%s3845_s3 + $0x12c] ss:$16 sps:$4 sm:$0xff]   ;;  %v1682_v36 = vld [vmem:[%s3848_s6] sm:$0x3] }
  0x3d   : > { %1478 = vmatpush1.bf16.msra.mxu0 %v2618_v48  ;;  %1437 = vmatpush1.bf16.msra.mxu1 %v2615_v50 }
  0x3e   : > { %1479 = vmatprep.subr.bf16.mxu0 %v2626_v49  ;;  %1438 = vmatprep.subr.bf16.mxu1 %v2623_v51 }
  0x41   : > { %1480 = vmatpush1.bf16.msra.mxu0 %v2624_v52  ;;  %1439 = vmatpush1.bf16.msra.mxu1 %v2621_v54 }
  0x42   : > { %1481 = vmatprep.subr.bf16.mxu0 %v2632_v53  ;;  %1440 = vmatprep.subr.bf16.mxu1 %v2629_v55 }
  0x45   : > { %1482 = vmatpush1.bf16.msra.mxu0 %v2630_v56  ;;  %1441 = vmatpush1.bf16.msra.mxu1 %v2627_v58 }
  0x46   : > { %1483 = vmatprep.subr.bf16.mxu0 %v2638_v57  ;;  %1442 = vmatprep.subr.bf16.mxu1 %v2635_v59 }
  0x49   : > { %1484 = vmatpush1.bf16.msra.mxu0 %v2636_v60  ;;  %1443 = vmatpush1.bf16.msra.mxu1 %v2633_v62 }
  0x4a   : > { %1485 = vmatprep.subr.bf16.mxu0 %v2644_v61  ;;  %1444 = vmatprep.subr.bf16.mxu1 %v2641_v63  ;;  %v2693_v63 = vld [vmem:[%s3845_s3 + $0x8] ss:$16 sps:$4 sm:$0xff]  }
  0x4d   : > { %1486 = vmatpush1.bf16.msra.mxu0 %v2642_v0  ;;  %1445 = vmatpush1.bf16.msra.mxu1 %v2639_v1 }
  0x4e   : > { %1487 = vmatprep.subr.bf16.mxu0 %v2650_v2  ;;  %1446 = vmatprep.subr.bf16.mxu1 %v2647_v3  ;;  %v2698_v3 = vld [vmem:[%s3845_s3 + $0x2c] ss:$16 sps:$4 sm:$0xff]  }
  0x51   : > { %1488 = vmatpush1.bf16.msra.mxu0 %v2648_v4  ;;  %1447 = vmatpush1.bf16.msra.mxu1 %v2645_v6  ;;  %v2789_v4 = vld [vmem:[%s3847_s5] ss:$8 sps:$4 sm:$0xff]  }
  0x52   : > { %1489 = vmatprep.subr.bf16.mxu0 %v2656_v5  ;;  %1448 = vmatprep.subr.bf16.mxu1 %v2653_v7  ;;  %v2791_v5 = vld [vmem:[%s3847_s5 + $0x4] ss:$8 sps:$4 sm:$0xff]   ;;  %v2696_v6 = vld [vmem:[%s3845_s3 + $0x28] ss:$16 sps:$4 sm:$0xff]   ;;  %v2794_v7 = vld [vmem:[%s3847_s5 + $0x14] ss:$8 sps:$4 sm:$0xff]  }
  0x55   : > { %1490 = vmatpush1.bf16.msra.mxu0 %v2654_v8  ;;  %1449 = vmatpush1.bf16.msra.mxu1 %v2651_v10  ;;  %v2701_v8 = vld [vmem:[%s3845_s3 + $0x4c] ss:$16 sps:$4 sm:$0xff]   ;;  %v2699_v10 = vld [vmem:[%s3845_s3 + $0x48] ss:$16 sps:$4 sm:$0xff]  }
  0x56   : > { %1491 = vmatprep.subr.bf16.mxu0 %v2662_v9  ;;  %1450 = vmatprep.subr.bf16.mxu1 %v2659_v11  ;;  %v2792_v9 = vld [vmem:[%s3847_s5 + $0x10] ss:$8 sps:$4 sm:$0xff]   ;;  %v2797_v11 = vld [vmem:[%s3847_s5 + $0x24] ss:$8 sps:$4 sm:$0xff]  }
  0x59   : > { %1492 = vmatpush1.bf16.msra.mxu0 %v2660_v12  ;;  %1451 = vmatpush1.bf16.msra.mxu1 %v2657_v14  ;;  %v2704_v12 = vld [vmem:[%s3845_s3 + $0x6c] ss:$16 sps:$4 sm:$0xff]   ;;  %v2702_v14 = vld [vmem:[%s3845_s3 + $0x68] ss:$16 sps:$4 sm:$0xff]  }
  0x5a   : > { %1493 = vmatprep.subr.bf16.mxu0 %v2668_v13  ;;  %1452 = vmatprep.subr.bf16.mxu1 %v2665_v15  ;;  %v2795_v13 = vld [vmem:[%s3847_s5 + $0x20] ss:$8 sps:$4 sm:$0xff]   ;;  %v2800_v15 = vld [vmem:[%s3847_s5 + $0x34] ss:$8 sps:$4 sm:$0xff]  }
  0x5d   : > { %1494 = vmatpush1.bf16.msra.mxu0 %v2666_v16  ;;  %1453 = vmatpush1.bf16.msra.mxu1 %v2663_v18  ;;  %v2707_v16 = vld [vmem:[%s3845_s3 + $0x8c] ss:$16 sps:$4 sm:$0xff]   ;;  %v2705_v18 = vld [vmem:[%s3845_s3 + $0x88] ss:$16 sps:$4 sm:$0xff]  }
  0x5e   : > { %1495 = vmatprep.subr.bf16.mxu0 %v2674_v17  ;;  %1454 = vmatprep.subr.bf16.mxu1 %v2671_v19  ;;  %v2798_v17 = vld [vmem:[%s3847_s5 + $0x30] ss:$8 sps:$4 sm:$0xff]   ;;  %v2803_v19 = vld [vmem:[%s3847_s5 + $0x44] ss:$8 sps:$4 sm:$0xff]  }
  0x61   : > { %1496 = vmatpush1.bf16.msra.mxu0 %v2672_v20  ;;  %1455 = vmatpush1.bf16.msra.mxu1 %v2669_v22  ;;  %v2710_v20 = vld [vmem:[%s3845_s3 + $0xac] ss:$16 sps:$4 sm:$0xff]   ;;  %v2708_v22 = vld [vmem:[%s3845_s3 + $0xa8] ss:$16 sps:$4 sm:$0xff]  }
  0x62   : > { %1497 = vmatprep.subr.bf16.mxu0 %v2680_v21  ;;  %1456 = vmatprep.subr.bf16.mxu1 %v2677_v23  ;;  %v2801_v21 = vld [vmem:[%s3847_s5 + $0x40] ss:$8 sps:$4 sm:$0xff]   ;;  %v2806_v23 = vld [vmem:[%s3847_s5 + $0x54] ss:$8 sps:$4 sm:$0xff]  }
  0x65   : > { %1498 = vmatpush1.bf16.msra.mxu0 %v2678_v24  ;;  %1457 = vmatpush1.bf16.msra.mxu1 %v2675_v25  ;;  %v2713_v24 = vld [vmem:[%s3845_s3 + $0xcc] ss:$16 sps:$4 sm:$0xff]   ;;  %v2804_v25 = vld [vmem:[%s3847_s5 + $0x50] ss:$8 sps:$4 sm:$0xff]  }
  0x66   : > { %1458 = vmatprep.subr.bf16.mxu1 %v2683_v26  ;;  %1499 = vmatprep.subr.bf16.mxu0 %v2686_v28  ;;  %v2711_v26 = vld [vmem:[%s3845_s3 + $0xc8] ss:$16 sps:$4 sm:$0xff]   ;;  %v2716_v28 = vld [vmem:[%s3845_s3 + $0xec] ss:$16 sps:$4 sm:$0xff]  }
  0x69   : > { %1459 = vmatpush1.bf16.msra.mxu1 %v2681_v27  ;;  %1500 = vmatpush1.bf16.msra.mxu0 %v2684_v29  ;;  %v2809_v27 = vld [vmem:[%s3847_s5 + $0x64] ss:$8 sps:$4 sm:$0xff]   ;;  %v2807_v29 = vld [vmem:[%s3847_s5 + $0x60] ss:$8 sps:$4 sm:$0xff]  }
  0x6a   : > { %1460 = vmatprep.subr.bf16.mxu1 %v2689_v30  ;;  %1501 = vmatprep.subr.bf16.mxu0 %v2692_v32  ;;  %v2714_v30 = vld [vmem:[%s3845_s3 + $0xe8] ss:$16 sps:$4 sm:$0xff]   ;;  %v2719_v32 = vld [vmem:[%s3845_s3 + $0x10c] ss:$16 sps:$4 sm:$0xff]  }
  0x6d   : > { %1461 = vmatpush1.bf16.msra.mxu1 %v2687_v31  ;;  %1502 = vmatpush1.bf16.msra.mxu0 %v2690_v33  ;;  %v2812_v31 = vld [vmem:[%s3847_s5 + $0x74] ss:$8 sps:$4 sm:$0xff]   ;;  %v2810_v33 = vld [vmem:[%s3847_s5 + $0x70] ss:$8 sps:$4 sm:$0xff]  }
  0x6e   : > { %1512 = vmatprep.subr.bf16.mxu1 %v2695_v34  ;;  %2028 = vmatprep.subr.bf16.mxu0 %v2791_v5  ;;  %v2717_v34 = vld [vmem:[%s3845_s3 + $0x108] ss:$16 sps:$4 sm:$0xff]   ;;  %v2743_v5 = vld [vmem:[%s3845_s3 + $0x20c] ss:$16 sps:$4 sm:$0xff]  }
 0x103   : > { %v584_v45 = vpop.f32.mrb[0].mxu0  ;;  %v625_v51 = vpop.f32.mrb[0].mxu1 }
 0x104   : > { %v585_v47 = vadd.f32 %v584_v45, %v373_v42  ;;  %v586_v48 = vpop.f32.mrb[1].mxu0  ;;  %v626_v53 = vadd.f32 %v625_v51, %v381_v44  ;;  %v627_v55 = vpop.f32.mrb[1].mxu1  ;;  %v2813_v42 = vld [vmem:[%s3847_s5 + $0x80] ss:$8 sps:$4 sm:$0xff]   ;;  %v2818_v44 = vld [vmem:[%s3847_s5 + $0x94] ss:$8 sps:$4 sm:$0xff]  }
 0x105   : > { %v587_v49 = vadd.f32 %v586_v48, %v377_v43  ;;  %v588_v50 = vpop.f32.mrb[2].mxu0  ;;  %v628_v57 = vadd.f32 %v627_v55, %v385_v46  ;;  %v629_v58 = vpop.f32.mrb[2].mxu1  ;;  %v2720_v43 = vld [vmem:[%s3845_s3 + $0x128] ss:$16 sps:$4 sm:$0xff]   ;;  %v2725_v45 = vld [vmem:[%s3845_s3 + $0x14c] ss:$16 sps:$4 sm:$0xff]  }
 0x106   : > { %v632_v52 = vmax.f32 %v585_v47, 0.0  ;;  %v589_v54 = vpop.f32.mrb[3].mxu0  ;;  %v634_v59 = vmax.f32 %v626_v53, 0.0  ;;  %v630_v60 = vpop.f32.mrb[3].mxu1  ;;  %v2816_v46 = vld [vmem:[%s3847_s5 + $0x90] ss:$8 sps:$4 sm:$0xff]  }
 0x107   : > { %v633_v56 = vmax.f32 %v587_v49, 0.0  ;;  %v635_v62 = vmax.f32 %v628_v57, 0.0  ;;  %v2723_v47 = vld [vmem:[%s3845_s3 + $0x148] ss:$16 sps:$4 sm:$0xff]   ;;  %v2821_v48 = vld [vmem:[%s3847_s5 + $0xa4] ss:$8 sps:$4 sm:$0xff]  }
 0x108   : > { %v3380_v0 = vpack.c.bf16 %v632_v52, %v632_v52  ;;  %v3382_v1 = vpack.c.bf16 %v634_v59, %v634_v59  ;;  %v2728_v49 = vld [vmem:[%s3845_s3 + $0x16c] ss:$16 sps:$4 sm:$0xff]   ;;  %v2819_v50 = vld [vmem:[%s3847_s5 + $0xa0] ss:$8 sps:$4 sm:$0xff]   ;;  %v2822_v54 = vld [vmem:[%s3847_s5 + $0xb0] ss:$8 sps:$4 sm:$0xff]  }
 0x109   : > { %v637_v61 = vpack.c.bf16 %v633_v56, %v633_v56  ;;  %v3384_v2 = vpack.c.bf16 %v635_v62, %v635_v62  ;;  %v2726_v51 = vld [vmem:[%s3845_s3 + $0x168] ss:$16 sps:$4 sm:$0xff]   ;;  %v2824_v52 = vld [vmem:[%s3847_s5 + $0xb4] ss:$8 sps:$4 sm:$0xff]   ;;  %v2827_v56 = vld [vmem:[%s3847_s5 + $0xc4] ss:$8 sps:$4 sm:$0xff]  }
 0x10a   : > { %v2731_v53 = vld [vmem:[%s3845_s3 + $0x18c] ss:$16 sps:$4 sm:$0xff]   ;;  %v2729_v55 = vld [vmem:[%s3845_s3 + $0x188] ss:$16 sps:$4 sm:$0xff]  }
 0x10b   : > { %1462 = vmatprep.mubr.bf16.mxu1 %v637_v61  ;;  %1503 = vmatprep.mubr.bf16.mxu0 %v3384_v2  ;;  %v2734_v57 = vld [vmem:[%s3845_s3 + $0x1ac] ss:$16 sps:$4 sm:$0xff]   ;;  %v2825_v58 = vld [vmem:[%s3847_s5 + $0xc0] ss:$8 sps:$4 sm:$0xff]   ;;  %v2828_v62 = vld [vmem:[%s3847_s5 + $0xd0] ss:$8 sps:$4 sm:$0xff]  }
 0x10c   : > { %1463 = vmatmul.mubr.bf16.vlgmr.msra.gmra.mrb[4].mxu1 %v3380_v0  ;;  %1504 = vmatmul.mubr.bf16.vlgmr.msra.gmra.mrb[4].mxu0 %v3382_v1  ;;  %v2732_v59 = vld [vmem:[%s3845_s3 + $0x1a8] ss:$16 sps:$4 sm:$0xff]   ;;  %v2830_v60 = vld [vmem:[%s3847_s5 + $0xd4] ss:$8 sps:$4 sm:$0xff]  }
 0x10d   : > { %1513 = vmatpush1.bf16.msra.mxu1 %v2693_v63  ;;  %1544 = vmatprep.mubr.bf16.mxu1 %v637_v61  ;;  %v2737_v61 = vld [vmem:[%s3845_s3 + $0x1cc] ss:$16 sps:$4 sm:$0xff]   ;;  %v2735_v63 = vld [vmem:[%s3845_s3 + $0x1c8] ss:$16 sps:$4 sm:$0xff]  }
 0x10e   : > { %1514 = vmatprep.subr.bf16.mxu1 %v2698_v3  ;;  %2029 = vmatpush1.bf16.msra.mxu0 %v2789_v4  ;;  %v2740_v3 = vld [vmem:[%s3845_s3 + $0x1ec] ss:$16 sps:$4 sm:$0xff]   ;;  %v2738_v4 = vld [vmem:[%s3845_s3 + $0x1e8] ss:$16 sps:$4 sm:$0xff]  }
 0x10f   : > { %2030 = vmatprep.subr.bf16.mxu0 %v2794_v7  ;;  %v2746_v7 = vld [vmem:[%s3845_s3 + $0x22c] ss:$16 sps:$4 sm:$0xff]  }
 0x111   : > { %1515 = vmatpush1.bf16.msra.mxu1 %v2696_v6  ;;  %v2741_v6 = vld [vmem:[%s3845_s3 + $0x208] ss:$16 sps:$4 sm:$0xff]  }
 0x112   : > { %1516 = vmatprep.subr.bf16.mxu1 %v2701_v8  ;;  %2031 = vmatpush1.bf16.msra.mxu0 %v2792_v9  ;;  %v2744_v8 = vld [vmem:[%s3845_s3 + $0x228] ss:$16 sps:$4 sm:$0xff]   ;;  %v2749_v9 = vld [vmem:[%s3845_s3 + $0x24c] ss:$16 sps:$4 sm:$0xff]  }
 0x113   : > { %2032 = vmatprep.subr.bf16.mxu0 %v2797_v11  ;;  %v2755_v11 = vld [vmem:[%s3845_s3 + $0x28c] ss:$16 sps:$4 sm:$0xff]  }
 0x115   : > { %1517 = vmatpush1.bf16.msra.mxu1 %v2699_v10  ;;  %v2747_v10 = vld [vmem:[%s3845_s3 + $0x248] ss:$16 sps:$4 sm:$0xff]  }
 0x116   : > { %1518 = vmatprep.subr.bf16.mxu1 %v2704_v12  ;;  %2033 = vmatpush1.bf16.msra.mxu0 %v2795_v13  ;;  %v2753_v12 = vld [vmem:[%s3845_s3 + $0x288] ss:$16 sps:$4 sm:$0xff]   ;;  %v2758_v13 = vld [vmem:[%s3845_s3 + $0x2ac] ss:$16 sps:$4 sm:$0xff]  }
 0x117   : > { %2034 = vmatprep.subr.bf16.mxu0 %v2800_v15  ;;  %v2761_v15 = vld [vmem:[%s3845_s3 + $0x2cc] ss:$16 sps:$4 sm:$0xff]  }
 0x119   : > { %1519 = vmatpush1.bf16.msra.mxu1 %v2702_v14  ;;  %v2756_v14 = vld [vmem:[%s3845_s3 + $0x2a8] ss:$16 sps:$4 sm:$0xff]  }
 0x11a   : > { %1520 = vmatprep.subr.bf16.mxu1 %v2707_v16  ;;  %2035 = vmatpush1.bf16.msra.mxu0 %v2798_v17  ;;  %v2759_v16 = vld [vmem:[%s3845_s3 + $0x2c8] ss:$16 sps:$4 sm:$0xff]   ;;  %v2833_v17 = vld [vmem:[%s3847_s5 + $0xe4] ss:$8 sps:$4 sm:$0xff]  }
 0x11b   : > { %2036 = vmatprep.subr.bf16.mxu0 %v2803_v19  ;;  %v2831_v19 = vld [vmem:[%s3847_s5 + $0xe0] ss:$8 sps:$4 sm:$0xff]  }
 0x11d   : > { %1521 = vmatpush1.bf16.msra.mxu1 %v2705_v18  ;;  %v2764_v18 = vld [vmem:[%s3845_s3 + $0x2ec] ss:$16 sps:$4 sm:$0xff]  }
 0x11e   : > { %1522 = vmatprep.subr.bf16.mxu1 %v2710_v20  ;;  %2037 = vmatpush1.bf16.msra.mxu0 %v2801_v21  ;;  %v2762_v20 = vld [vmem:[%s3845_s3 + $0x2e8] ss:$16 sps:$4 sm:$0xff]   ;;  %v2836_v21 = vld [vmem:[%s3847_s5 + $0xf4] ss:$8 sps:$4 sm:$0xff]  }
 0x11f   : > { %2038 = vmatprep.subr.bf16.mxu0 %v2806_v23  ;;  %v2834_v23 = vld [vmem:[%s3847_s5 + $0xf0] ss:$8 sps:$4 sm:$0xff]  }
 0x121   : > { %1523 = vmatpush1.bf16.msra.mxu1 %v2708_v22  ;;  %v2767_v22 = vld [vmem:[%s3845_s3 + $0x30c] ss:$16 sps:$4 sm:$0xff]  }
 0x122   : > { %1524 = vmatprep.subr.bf16.mxu1 %v2713_v24  ;;  %2039 = vmatpush1.bf16.msra.mxu0 %v2804_v25  ;;  %v2765_v24 = vld [vmem:[%s3845_s3 + $0x308] ss:$16 sps:$4 sm:$0xff]   ;;  %v2770_v25 = vld [vmem:[%s3845_s3 + $0x32c] ss:$16 sps:$4 sm:$0xff]  }
 0x123   : > { %2040 = vmatprep.subr.bf16.mxu0 %v2809_v27  ;;  %v2768_v27 = vld [vmem:[%s3845_s3 + $0x328] ss:$16 sps:$4 sm:$0xff]  }
 0x125   : > { %1525 = vmatpush1.bf16.msra.mxu1 %v2711_v26  ;;  %v2839_v26 = vld [vmem:[%s3847_s5 + $0x104] ss:$8 sps:$4 sm:$0xff]  }
 0x126   : > { %1526 = vmatprep.subr.bf16.mxu1 %v2716_v28  ;;  %2041 = vmatpush1.bf16.msra.mxu0 %v2807_v29  ;;  %v2773_v28 = vld [vmem:[%s3845_s3 + $0x34c] ss:$16 sps:$4 sm:$0xff]   ;;  %v2771_v29 = vld [vmem:[%s3845_s3 + $0x348] ss:$16 sps:$4 sm:$0xff]  }
 0x127   : > { %2042 = vmatprep.subr.bf16.mxu0 %v2812_v31  ;;  %v2774_v31 = vld [vmem:[%s3845_s3 + $0x368] ss:$16 sps:$4 sm:$0xff]  }
 0x129   : > { %1527 = vmatpush1.bf16.msra.mxu1 %v2714_v30  ;;  %v2776_v30 = vld [vmem:[%s3845_s3 + $0x36c] ss:$16 sps:$4 sm:$0xff]  }
 0x12a   : > { %1528 = vmatprep.subr.bf16.mxu1 %v2719_v32  ;;  %2043 = vmatpush1.bf16.msra.mxu0 %v2810_v33  ;;  %v2779_v32 = vld [vmem:[%s3845_s3 + $0x38c] ss:$16 sps:$4 sm:$0xff]   ;;  %v2777_v33 = vld [vmem:[%s3845_s3 + $0x388] ss:$16 sps:$4 sm:$0xff]  }
 0x12b   : > { %2044 = vmatprep.subr.bf16.mxu0 %v2815_v35  ;;  %v2780_v35 = vld [vmem:[%s3845_s3 + $0x3a8] ss:$16 sps:$4 sm:$0xff]  }
 0x12d   : > { %1529 = vmatpush1.bf16.msra.mxu1 %v2717_v34  ;;  %v2782_v34 = vld [vmem:[%s3845_s3 + $0x3ac] ss:$16 sps:$4 sm:$0xff]  }
 0x12e   : > { %1530 = vmatprep.subr.bf16.mxu1 %v2722_v38  ;;  %2045 = vmatpush1.bf16.msra.mxu0 %v2813_v42  ;;  %v2785_v38 = vld [vmem:[%s3845_s3 + $0x3cc] ss:$16 sps:$4 sm:$0xff]   ;;  %v2783_v42 = vld [vmem:[%s3845_s3 + $0x3c8] ss:$16 sps:$4 sm:$0xff]  }
 0x12f   : > { %2046 = vmatprep.subr.bf16.mxu0 %v2818_v44  ;;  %v2786_v44 = vld [vmem:[%s3845_s3 + $0x3e8] ss:$16 sps:$4 sm:$0xff]  }
 0x131   : > { %1531 = vmatpush1.bf16.msra.mxu1 %v2720_v43  ;;  %v2788_v43 = vld [vmem:[%s3845_s3 + $0x3ec] ss:$16 sps:$4 sm:$0xff]  }
 0x132   : > { %1532 = vmatprep.subr.bf16.mxu1 %v2725_v45  ;;  %2047 = vmatpush1.bf16.msra.mxu0 %v2816_v46  ;;  %v3680_v45 = vld [vmem:[%s3846_s4] sm:$0xf] }
 0x133   : > { %2048 = vmatprep.subr.bf16.mxu0 %v2821_v48  ;;  %v773_v46 = vrot.slane %v3680_v45, %v3361_v37 }
 0x135   : > { %1533 = vmatpush1.bf16.msra.mxu1 %v2723_v47  ;;  %v777_v47 = vrot.slane %v3680_v45, %v3367_v39 }
 0x136   : > { %1534 = vmatprep.subr.bf16.mxu1 %v2728_v49  ;;  %2049 = vmatpush1.bf16.msra.mxu0 %v2819_v50 }
 0x137   : > { %2050 = vmatprep.subr.bf16.mxu0 %v2824_v52 }
 0x139   : > { %1535 = vmatpush1.bf16.msra.mxu1 %v2726_v51 }
 0x13a   : > { %1536 = vmatprep.subr.bf16.mxu1 %v2731_v53  ;;  %2051 = vmatpush1.bf16.msra.mxu0 %v2822_v54 }
 0x13b   : > { %2052 = vmatprep.subr.bf16.mxu0 %v2827_v56 }
 0x13d   : > { %1537 = vmatpush1.bf16.msra.mxu1 %v2729_v55 }
 0x13e   : > { %1538 = vmatprep.subr.bf16.mxu1 %v2734_v57  ;;  %2053 = vmatpush1.bf16.msra.mxu0 %v2825_v58 }
 0x13f   : > { %2054 = vmatprep.subr.bf16.mxu0 %v2830_v60 }
 0x141   : > { %1539 = vmatpush1.bf16.msra.mxu1 %v2732_v59 }
 0x142   : > { %1540 = vmatprep.subr.bf16.mxu1 %v2737_v61  ;;  %2055 = vmatpush1.bf16.msra.mxu0 %v2828_v62  ;;  %v2837_v62 = vld [vmem:[%s3847_s5 + $0x100] ss:$8 sps:$4 sm:$0xff]  }
 0x143   : > { %2056 = vmatprep.subr.bf16.mxu0 %v2833_v17  ;;  %v2866_v17 = vld [vmem:[%s3847_s5 + $0x194] ss:$8 sps:$4 sm:$0xff]  }
 0x145   : > { %1541 = vmatpush1.bf16.msra.mxu1 %v2735_v63 }
 0x146   : > { %1542 = vmatprep.subr.bf16.mxu1 %v2740_v3  ;;  %2057 = vmatpush1.bf16.msra.mxu0 %v2831_v19  ;;  %v2842_v3 = vld [vmem:[%s3847_s5 + $0x114] ss:$8 sps:$4 sm:$0xff]   ;;  %v2869_v19 = vld [vmem:[%s3847_s5 + $0x1a4] ss:$8 sps:$4 sm:$0xff]  }
 0x147   : > { %2058 = vmatprep.subr.bf16.mxu0 %v2836_v21  ;;  %v2872_v21 = vld [vmem:[%s3847_s5 + $0x1b4] ss:$8 sps:$4 sm:$0xff]  }
 0x149   : > { %1543 = vmatpush1.bf16.msra.mxu1 %v2738_v4  ;;  %v2840_v4 = vld [vmem:[%s3847_s5 + $0x110] ss:$8 sps:$4 sm:$0xff]  }
 0x14a   : > { %1553 = vmatprep.subr.bf16.mxu1 %v2743_v5  ;;  %2059 = vmatpush1.bf16.msra.mxu0 %v2834_v23  ;;  %v2845_v5 = vld [vmem:[%s3847_s5 + $0x124] ss:$8 sps:$4 sm:$0xff]  }
 0x14b   : > { %2069 = vmatprep.subr.bf16.mxu0 %v2839_v26  ;;  %v2875_v23 = vld [vmem:[%s3847_s5 + $0x1c4] ss:$8 sps:$4 sm:$0xff]   ;;  %v2876_v26 = vld [vmem:[%s3847_s5 + $0x1d0] ss:$8 sps:$4 sm:$0xff]  }
 0x14c   : > { %1545 = vmatmul.mubr.bf16.vlgmr.msra.gmra.mrb[8].mxu1 %v3380_v0  ;;  %v2752_v0 = vld [vmem:[%s3845_s3 + $0x26c] ss:$16 sps:$4 sm:$0xff]  }
 0x14d   : > { %1554 = vmatpush1.bf16.msra.mxu1 %v2741_v6  ;;  %1585 = vmatprep.mubr.bf16.mxu1 %v3384_v2  ;;  %v2750_v2 = vld [vmem:[%s3845_s3 + $0x268] ss:$16 sps:$4 sm:$0xff]  }
 0x14e   : > { %1555 = vmatprep.subr.bf16.mxu1 %v2746_v7  ;;  %v2843_v6 = vld [vmem:[%s3847_s5 + $0x120] ss:$8 sps:$4 sm:$0xff]   ;;  %v2848_v7 = vld [vmem:[%s3847_s5 + $0x134] ss:$8 sps:$4 sm:$0xff]  }
 0x151   : > { %1556 = vmatpush1.bf16.msra.mxu1 %v2744_v8  ;;  %v2846_v8 = vld [vmem:[%s3847_s5 + $0x130] ss:$8 sps:$4 sm:$0xff]  }
 0x152   : > { %1557 = vmatprep.subr.bf16.mxu1 %v2749_v9  ;;  %v2851_v9 = vld [vmem:[%s3847_s5 + $0x144] ss:$8 sps:$4 sm:$0xff]  }
 0x155   : > { %1558 = vmatpush1.bf16.msra.mxu1 %v2747_v10  ;;  %v2849_v10 = vld [vmem:[%s3847_s5 + $0x140] ss:$8 sps:$4 sm:$0xff]  }
 0x156   : > { %1559 = vmatprep.subr.bf16.mxu1 %v2752_v0  ;;  %v2854_v0 = vld [vmem:[%s3847_s5 + $0x154] ss:$8 sps:$4 sm:$0xff]  }
 0x159   : > { %1560 = vmatpush1.bf16.msra.mxu1 %v2750_v2  ;;  %v2852_v2 = vld [vmem:[%s3847_s5 + $0x150] ss:$8 sps:$4 sm:$0xff]  }
 0x15a   : > { %1561 = vmatprep.subr.bf16.mxu1 %v2755_v11  ;;  %v2857_v11 = vld [vmem:[%s3847_s5 + $0x164] ss:$8 sps:$4 sm:$0xff]  }
 0x15d   : > { %1562 = vmatpush1.bf16.msra.mxu1 %v2753_v12  ;;  %v2855_v12 = vld [vmem:[%s3847_s5 + $0x160] ss:$8 sps:$4 sm:$0xff]  }
 0x15e   : > { %1563 = vmatprep.subr.bf16.mxu1 %v2758_v13  ;;  %v2860_v13 = vld [vmem:[%s3847_s5 + $0x174] ss:$8 sps:$4 sm:$0xff]  }
 0x161   : > { %1564 = vmatpush1.bf16.msra.mxu1 %v2756_v14  ;;  %v2858_v14 = vld [vmem:[%s3847_s5 + $0x170] ss:$8 sps:$4 sm:$0xff]  }
 0x162   : > { %1565 = vmatprep.subr.bf16.mxu1 %v2761_v15  ;;  %v2863_v15 = vld [vmem:[%s3847_s5 + $0x184] ss:$8 sps:$4 sm:$0xff]  }
 0x165   : > { %1566 = vmatpush1.bf16.msra.mxu1 %v2759_v16  ;;  %v2861_v16 = vld [vmem:[%s3847_s5 + $0x180] ss:$8 sps:$4 sm:$0xff]  }
 0x166   : > { %1567 = vmatprep.subr.bf16.mxu1 %v2764_v18  ;;  %v2864_v18 = vld [vmem:[%s3847_s5 + $0x190] ss:$8 sps:$4 sm:$0xff]  }
 0x169   : > { %1568 = vmatpush1.bf16.msra.mxu1 %v2762_v20  ;;  %v2867_v20 = vld [vmem:[%s3847_s5 + $0x1a0] ss:$8 sps:$4 sm:$0xff]  }
 0x16a   : > { %1569 = vmatprep.subr.bf16.mxu1 %v2767_v22  ;;  %v2870_v22 = vld [vmem:[%s3847_s5 + $0x1b0] ss:$8 sps:$4 sm:$0xff]  }
 0x16d   : > { %1570 = vmatpush1.bf16.msra.mxu1 %v2765_v24  ;;  %v2873_v24 = vld [vmem:[%s3847_s5 + $0x1c0] ss:$8 sps:$4 sm:$0xff]  }
 0x16e   : > { %1571 = vmatprep.subr.bf16.mxu1 %v2770_v25  ;;  %v2878_v25 = vld [vmem:[%s3847_s5 + $0x1d4] ss:$8 sps:$4 sm:$0xff]  }
 0x171   : > { %1572 = vmatpush1.bf16.msra.mxu1 %v2768_v27  ;;  %v2881_v27 = vld [vmem:[%s3847_s5 + $0x1e4] ss:$8 sps:$4 sm:$0xff]  }
 0x172   : > { %1573 = vmatprep.subr.bf16.mxu1 %v2773_v28  ;;  %v2879_v28 = vld [vmem:[%s3847_s5 + $0x1e0] ss:$8 sps:$4 sm:$0xff]  }
 0x175   : > { %1574 = vmatpush1.bf16.msra.mxu1 %v2771_v29  ;;  %v2884_v29 = vld [vmem:[%s3847_s5 + $0x1f4] ss:$8 sps:$4 sm:$0xff]  }
 0x176   : > { %1575 = vmatprep.subr.bf16.mxu1 %v2776_v30  ;;  %v2882_v30 = vld [vmem:[%s3847_s5 + $0x1f0] ss:$8 sps:$4 sm:$0xff]  }
 0x179   : > { %1576 = vmatpush1.bf16.msra.mxu1 %v2774_v31  ;;  %v781_v31 = vrot.slane %v3680_v45, %v380_v40  ;;  %v1687_v40 = vrot.slane %v1682_v36, %v3361_v37 }
 0x17a   : > { %1577 = vmatprep.subr.bf16.mxu1 %v2779_v32  ;;  %v785_v32 = vrot.slane %v3680_v45, %v384_v41  ;;  %v1691_v41 = vrot.slane %v1682_v36, %v3367_v39 }
 0x17d   : > { %1578 = vmatpush1.bf16.msra.mxu1 %v2777_v33 }
 0x17e   : > { %1579 = vmatprep.subr.bf16.mxu1 %v2782_v34 }
 0x181   : > { %1580 = vmatpush1.bf16.msra.mxu1 %v2780_v35 }
 0x182   : > { %1581 = vmatprep.subr.bf16.mxu1 %v2785_v38 }
 0x185   : > { %1582 = vmatpush1.bf16.msra.mxu1 %v2783_v42 }
 0x186   : > { %1583 = vmatprep.subr.bf16.mxu1 %v2788_v43 }
 0x189   : > { %1584 = vmatpush1.bf16.msra.mxu1 %v2786_v44 }
 0x18c   : > { %1586 = vmatmul.mubr.bf16.vlgmr.msra.gmra.mrb[8].mxu1 %v3382_v1 }
 0x1df   : > { %v1464_v48 = vpop.f32.mrb[4].mxu1  ;;  %v1505_v53 = vpop.f32.mrb[4].mxu0 }
 0x1e0   : > { %v1465_v49 = vadd.f32 %v1464_v48, %v773_v46  ;;  %v1466_v50 = vpop.f32.mrb[5].mxu1  ;;  %v1507_v1 = vpop.f32.mrb[5].mxu0 }
 0x1e1   : > { %v1467_v51 = vadd.f32 %v1466_v50, %v777_v47  ;;  %v1468_v52 = vpop.f32.mrb[6].mxu1  ;;  %v1509_v57 = vpop.f32.mrb[6].mxu0 }
 0x1e2   : > { %v1506_v54 = vadd.f32 %v1505_v53, %v1465_v49  ;;  %v1469_v55 = vpop.f32.mrb[7].mxu1  ;;  %v1510_v59 = vpop.f32.mrb[7].mxu0 }
 0x1e3   : > { %v1508_v56 = vadd.f32 %v1507_v1, %v1467_v51 }
 0x1e4   : > { %v1594_v58 = vmax.f32 %v1506_v54, 0.0 }
 0x1e5   : > { %v1595_v60 = vmax.f32 %v1508_v56, 0.0 }
 0x1e6   : > { %v2473_v63 = vpack.c.bf16 %v1594_v58, %v1594_v58 }
 0x1e7   : > { %v2474_v61 = vpack.c.bf16 %v1595_v60, %v1595_v60 }
 0x1e9   : > { %2060 = vmatprep.mubr.bf16.mxu0 %v2474_v61 }
 0x1ea   : > { %2061 = vmatmul.mubr.bf16.vlgmr.msra.gmra.mrb[8].mxu0 %v2473_v63 }
 0x1eb   : > { %2070 = vmatpush1.bf16.msra.mxu0 %v2837_v62 }
 0x1ec   : > { %2071 = vmatprep.subr.bf16.mxu0 %v2842_v3 }
 0x1ef   : > { %2072 = vmatpush1.bf16.msra.mxu0 %v2840_v4 }
 0x1f0   : > { %2073 = vmatprep.subr.bf16.mxu0 %v2845_v5 }
 0x1f3   : > { %2074 = vmatpush1.bf16.msra.mxu0 %v2843_v6 }
 0x1f4   : > { %2075 = vmatprep.subr.bf16.mxu0 %v2848_v7 }
 0x1f7   : > { %2076 = vmatpush1.bf16.msra.mxu0 %v2846_v8 }
 0x1f8   : > { %2077 = vmatprep.subr.bf16.mxu0 %v2851_v9 }
 0x1fb   : > { %2078 = vmatpush1.bf16.msra.mxu0 %v2849_v10 }
 0x1fc   : > { %2079 = vmatprep.subr.bf16.mxu0 %v2854_v0 }
 0x1ff   : > { %2080 = vmatpush1.bf16.msra.mxu0 %v2852_v2 }
 0x200   : > { %2081 = vmatprep.subr.bf16.mxu0 %v2857_v11 }
 0x203   : > { %2082 = vmatpush1.bf16.msra.mxu0 %v2855_v12 }
 0x204   : > { %2083 = vmatprep.subr.bf16.mxu0 %v2860_v13 }
 0x207   : > { %2084 = vmatpush1.bf16.msra.mxu0 %v2858_v14 }
 0x208   : > { %2085 = vmatprep.subr.bf16.mxu0 %v2863_v15 }
 0x20b   : > { %2086 = vmatpush1.bf16.msra.mxu0 %v2861_v16 }
 0x20c   : > { %2087 = vmatprep.subr.bf16.mxu0 %v2866_v17 }
 0x20f   : > { %2088 = vmatpush1.bf16.msra.mxu0 %v2864_v18 }
 0x210   : > { %2089 = vmatprep.subr.bf16.mxu0 %v2869_v19 }
 0x213   : > { %2090 = vmatpush1.bf16.msra.mxu0 %v2867_v20 }
 0x214   : > { %2091 = vmatprep.subr.bf16.mxu0 %v2872_v21 }
 0x217   : > { %2092 = vmatpush1.bf16.msra.mxu0 %v2870_v22 }
 0x218   : > { %2093 = vmatprep.subr.bf16.mxu0 %v2875_v23 }
 0x21b   : > { %2094 = vmatpush1.bf16.msra.mxu0 %v2873_v24 }
 0x21c   : > { %2095 = vmatprep.subr.bf16.mxu0 %v2878_v25 }
 0x21f   : > { %2096 = vmatpush1.bf16.msra.mxu0 %v2876_v26 }
 0x220   : > { %2097 = vmatprep.subr.bf16.mxu0 %v2881_v27 }
 0x223   : > { %2098 = vmatpush1.bf16.msra.mxu0 %v2879_v28 }
 0x224   : > { %2099 = vmatprep.subr.bf16.mxu0 %v2884_v29 }
 0x227   : > { %2100 = vmatpush1.bf16.msra.mxu0 %v2882_v30 }
 0x25f   : > { %v1587_v33 = vpop.f32.mrb[8].mxu1 }
 0x260   : > { %v2481_v34 = vadd.f32 %v1587_v33, %v781_v31  ;;  %v1589_v35 = vpop.f32.mrb[9].mxu1 }
 0x261   : > { %v2482_v38 = vadd.f32 %v1589_v35, %v785_v32  ;;  %v1591_v42 = vpop.f32.mrb[10].mxu1 }
 0x262   : > { %v1596_v43 = vmax.f32 %v2481_v34, 0.0  ;;  %v1592_v44 = vpop.f32.mrb[11].mxu1 }
 0x263   : > { %v1597_v46 = vmax.f32 %v2482_v38, 0.0 }
 0x264   : > { %v2475_v48 = vpack.c.bf16 %v1596_v43, %v1596_v43 }
 0x265   : > { %v2476_v47 = vpack.c.bf16 %v1597_v46, %v1597_v46 }
 0x267   : > { %2101 = vmatprep.mubr.bf16.mxu0 %v2476_v47 }
 0x268   : > { %2102 = vmatmul.mubr.bf16.vlgmr.msra.gmra.mrb[8].mxu0 %v2475_v48 }
 0x33b   : > { %v2103_v45 = vpop.f32.mrb[8].mxu0 }
 0x33c   : > { %v2483_v49 = vadd.f32 %v2103_v45, %v1687_v40  ;;  %v2105_v50 = vpop.f32.mrb[9].mxu0 }
 0x33d   : > { %v2484_v51 = vadd.f32 %v2105_v50, %v1691_v41  ;;  %v2107_v52 = vpop.f32.mrb[10].mxu0 }
 0x33e   : > { %2110 = vst [vmem:[%s313_s23] sm:$0xff] %v2483_v49  ;;  %v2108_v37 = vpop.f32.mrb[11].mxu0 }
 0x33f   : > { %2111 = vst [vmem:[%s313_s23 + $0x8] sm:$0xff] %v2484_v51 }
 0x340   : > { %2898 = shalt.err (!%p2895_p5)
}
 0x341   : > { %s2899_s30 = scalar_lea.hbm %s3795_s12, 256  ;;  %s2903_s22 = scalar_lea.hbm %s3849_s7, 512 }
 0x342   : > { %p2900_p6 = scmp.ne.s32.totalorder %s3795_s12, %s2899_s30  ;;  %p2904_p10 = scmp.lt.u32.totalorder %s3795_s12, %s3849_s7 }
 0x343   : > { %p2905_p11 = scmp.lt.u32.totalorder %s2903_s22, %s2899_s30  ;;  %p2907_p13 = scmp.lt.u32.totalorder %s2899_s30, %s3795_s12 }
 0x344   : > { %p2901_p7 = pnand %p2900_p6, %p3047_p4 }
 0x345   : > { %p2906_p12 = por %p2905_p11, %p2904_p10 }
 0x346   : > { %p2902_p9 = pneg %p2901_p7 }
 0x347   : > { %p2908_p0 = por %p2907_p13, %p2906_p12 }
 0x349   : > { %p2909_p1 = pnand %p2908_p0, %p2902_p9 }
 0x34b   : > { %2912 = shalt.err (!%p2909_p1)
}
 0x34c   : > { %2493 = dma.vmem_to_hbm [thread:$0]  (%p3047_p4), %s3797_s8, 256, %s3795_s12, %s2113_s27  }
 0x34d PF: > { %p2499_p2 = scmp.ge.s32.totalorder %s2963_s29, 2  ;;  %s2141_s20 = sand.u32 1, %s2943_s24  }
 0x34e   : > { %s2142_s15 = scalar_lea.sflag [#allocation4], %s2141_s20 }
 0x34f   : > { %p2496_p3 = pnand %p2499_p2, %p3054_p8 }
 0x351   : > { %2938 = dma.done.wait (!%p2496_p3), %s2142_s15, 256  }
 0x352   : > { %2940 = vsyncadd (!%p2496_p3), %s2142_s15, 4294967040  ;;  %s20_s29 = sadd.s32 1, %s2963_s29   ;;  %s3852_s24 = smov %s2947_s25 }
 0x353   : > { %p17_p5 = scmp.ge.s32.totalorder %s20_s29, 4   ;;  %s3853_s25 = smov %s2951_s26 }
 0x354   : > { %s3854_s26 = smov %s3060_s14  ;;  %s3855_s27 = smov %s2959_s28 }
 0x355   : > { %s3856_s28 = smov %s3858_s9  ;;  %19 = sbr.rel (!%p17_p5) target bundleno = 4 (0x4), region = 93 }
 0x35c   :  { %2147 = vsyncpa [#allocation4], 1 }
 0x35d   :  { %2149 = vsyncpa [#allocation4 + $0x1], 1 }

</bundles_post_ra>
